<compile_context>
chip_gen: v7x
topology: tpu7x:2x2x1
jax: 0.10.0
libtpu: 0.0.40
codegen_flags: <defaults>
</compile_context>

<pallas_src>
import math
import jax
import jax.numpy as jnp
from jax.experimental import pallas as pl
from jax.experimental.pallas import tpu as pltpu


# hyper-parameters of the first training-mode forward step (static constants)
A_CURV = min(1.0, 0.0 + 0.001)                 # curvature multiplier a
B_RELOG = 1.0 * max(0.0001, 0.0 + 0.001)       # ReLog effective beta (beta=1)
INV_B_RELOG = 1.0 / B_RELOG
GAMMA = 1.0


def _relog(x):
    # ReLog(x) = log1p(b * relu(x)) / b   (divide replaced by constant multiply)
    return jnp.log1p(B_RELOG * jnp.maximum(x, 0.0)) * INV_B_RELOG


# ----------------------------------------------------------------------------
# Fused Pallas kernel: one batch sample per grid step
# ----------------------------------------------------------------------------
def _fused_model_kernel(p_ref, wc_ref, bc_ref, w1_ref, b1_ref, w2_ref, b2_ref,
                        feat_ref, out_ref):
    """Whole ExperimentalModel forward for one sample.

    p_ref   : [1, KP, M]      im2col patches, K padded 36->40, M = H*W (lane dense)
    wc_ref  : [8, 2*KP]       conv weights; rows 0-3 = fold member 0 (out chans
                              0,2,4,6), rows 4-7 = member 1 (1,3,5,7);
                              columns = [Wl_pad | -a*|Wq|_pad]
    bc_ref  : [8, 1]          conv bias + a*gamma (same row order)
    w1_ref  : [CH, 2*M, HID]  fc1 weights split per conv feature channel c and
                              K-stacked [Wl_c ; -a*|Wq|_c]; columns 0-7 = even
                              hidden units (fold member 0), 8-15 = odd units
    b1_ref  : [1, HID]        fc1 bias + a*gamma (same column order)
    w2_ref  : [HID/2, NC]     final linear weight (transposed)
    b2_ref  : [1, NC]
    feat_ref: [1, CH, M]      features after maxout + ReLog
    out_ref : [1, 1, NC]      logits
    """
    ch = feat_ref.shape[1]          # 4  folded conv channels
    hid = b1_ref.shape[1]           # 16 fc1 outputs (pre-maxout)
    hh = hid // 2                   # 8  folded hidden units

    # ---- features: elliptical conv as ONE MXU dot on [p ; p*p] ----
    p = p_ref[0]                                        # [KP, M]
    pa = jnp.concatenate([p, p * p], axis=0)            # [2*KP, M], tile-aligned
    z = (jnp.dot(wc_ref[...], pa, preferred_element_type=jnp.float32)
         + bc_ref[...])                                 # [8, M]
    m = jnp.maximum(z[:ch, :], z[ch:2 * ch, :])         # FoldingMaxout(k=2, dim=1)
    r = _relog(m)                                       # [CH, M]
    feat_ref[0] = r                                     # flat = reshape outside

    # ---- classifier: elliptical fc1 + maxout + ReLog + final linear ----
    ra = jnp.concatenate([r, r * r], axis=1)            # [CH, 2*M], lane-aligned
    h = b1_ref[...]                                     # [1, HID]
    for c in range(ch):                                 # CH tiny dots == one K=2*CH*M dot
        h = h + jnp.dot(ra[c:c + 1, :], w1_ref[c],
                        preferred_element_type=jnp.float32)
    hm = jnp.maximum(h[:, :hh], h[:, hh:2 * hh])        # FoldingMaxout(k=2, dim=1)
    rr = _relog(hm)                                     # [1, HID/2]
    out_ref[0] = (jnp.dot(rr, w2_ref[...], preferred_element_type=jnp.float32)
                  + b2_ref[...])                        # [1, NC]


# ----------------------------------------------------------------------------
# Parameters: "module-style" init + one-time kernel-ready preparation
# ----------------------------------------------------------------------------
def init_params(key, c_in=4, conv_out=8, h=16, w=16, hidden=16, n_classes=10):
    """Random params in PyTorch-equivalent layouts (weights are [out, in]).
    Conv weights are kept directly in im2col form [C_out, 9*C_in]; the K
    ordering is whatever conv_general_dilated_patches produces (self-consistent
    here since the weights are random, not loaded from a real PyTorch conv)."""
    ks = jax.random.split(key, 8)

    def u(k, shape, fan_in):
        bound = 1.0 / math.sqrt(fan_in)
        return jax.random.uniform(k, shape, jnp.float32, -bound, bound)

    kdim = 9 * c_in
    feat_dim = (conv_out // 2) * h * w     # classifier input size after maxout
    return {
        "conv_wl": u(ks[0], (conv_out, kdim), kdim),
        "conv_wq": u(ks[1], (conv_out, kdim), kdim),
        "conv_b":  u(ks[2], (conv_out,), kdim),
        "fc1_wl": u(ks[3], (hidden, feat_dim), feat_dim),
        "fc1_wq": u(ks[4], (hidden, feat_dim), feat_dim),
        "fc1_b":  u(ks[5], (hidden,), feat_dim),
        "fc2_w": u(ks[6], (n_classes, hidden // 2), hidden // 2),
        "fc2_b": u(ks[7], (n_classes,), hidden // 2),
    }


def prepare_params(p):
    """One-time transform into kernel-ready form.

    - abs(Wq) and the -a scaling folded into the quadratic weights, a*gamma
      into the biases (elliptical: Wl x + b - a*|Wq| x^2 + a*g).
    - FoldingMaxout(k=2, dim=1) pairs consecutive channels/units (2c, 2c+1)
      [PyTorch reshape is view(C//k, k)]: fold members pre-split so the kernel
      only needs a slice + jnp.maximum.
    - Conv: both fold members stacked in the 8 output rows, linear+quadratic
      stacked along K (padded 36->40 so the in-kernel [p;p^2] concat is
      8-tile aligned; pad columns are zero).
    - fc1: weight split per conv feature channel (flat index k = c*M + m) and
      K-stacked [Wl_c ; -a*|Wq|_c] -> [CH, 2*M, HID]; fold members in the
      output columns (0..7 even units, 8..15 odd units).
    """
    a = A_CURV

    conv_out, kdim = p["conv_wl"].shape          # (8, 36)
    ch = conv_out // 2
    kpad = ((kdim + 7) // 8) * 8                 # 40

    def conv_fold_rows(wmat):
        # channel pair (2c, 2c+1) -> rows [c] and [ch + c]
        return wmat.reshape(ch, 2, kdim).transpose(1, 0, 2).reshape(conv_out, kdim)

    pad = ((0, 0), (0, kpad - kdim))
    wl = jnp.pad(conv_fold_rows(p["conv_wl"]), pad)
    wq = jnp.pad(conv_fold_rows((-a) * jnp.abs(p["conv_wq"])), pad)
    conv_w = jnp.concatenate([wl, wq], axis=1)                       # [8, 2*kpad]
    conv_b = (p["conv_b"] + a * GAMMA).reshape(ch, 2).T.reshape(conv_out, 1)

    hidden, feat_dim = p["fc1_wl"].shape         # (16, 1024)
    hh = hidden // 2
    m = feat_dim // ch                           # 256

    def fc1_fold_cols(wmat):
        # hidden pair (2i, 2i+1) -> columns [i] and [hh + i]; transposed to [F, hidden]
        return (wmat.reshape(hh, 2, feat_dim).transpose(1, 0, 2)
                .reshape(hidden, feat_dim).T)

    w1l = fc1_fold_cols(p["fc1_wl"]).reshape(ch, m, hidden)
    w1q = fc1_fold_cols((-a) * jnp.abs(p["fc1_wq"])).reshape(ch, m, hidden)
    fc1_w = jnp.concatenate([w1l, w1q], axis=1)                      # [ch, 2*m, hidden]
    fc1_b = (p["fc1_b"] + a * GAMMA).reshape(hh, 2).T.reshape(1, hidden)

    fc2_w = p["fc2_w"].T                                             # [hh, n_classes]
    fc2_b = p["fc2_b"].reshape(1, -1)
    return {"conv_w": conv_w, "conv_b": conv_b,
            "fc1_w": fc1_w, "fc1_b": fc1_b, "fc2_w": fc2_w, "fc2_b": fc2_b}


# ----------------------------------------------------------------------------
# Forward pass  (returns (out, flat) exactly like ExperimentalModel.forward)
# ----------------------------------------------------------------------------
def experimental_model_forward(kp, x_nchw):
    N, C, H, W = x_nchw.shape
    M = H * W
    kpad = kp["conv_w"].shape[1] // 2
    ch = kp["conv_w"].shape[0] // 2
    n_classes = kp["fc2_b"].shape[-1]

    # im2col glue (one XLA op) + zero pad K 36 -> 40 (aligned sublane concat;
    # the matching weight columns are zero, so the pad values are inert).
    patches = jax.lax.conv_general_dilated_patches(
        x_nchw, filter_shape=(3, 3), window_strides=(1, 1),
        padding=((1, 1), (1, 1)),
        precision=jax.lax.Precision.HIGHEST)               # [N, 9*C, H, W]
    patches = patches.reshape(N, 9 * C, M)
    patches = jnp.pad(patches, ((0, 0), (0, kpad - 9 * C), (0, 0)))   # [N, 40, M]

    feat, out3 = pl.pallas_call(
        _fused_model_kernel,
        out_shape=(jax.ShapeDtypeStruct((N, ch, M), jnp.float32),
                   jax.ShapeDtypeStruct((N, 1, n_classes), jnp.float32)),
        grid=(N,),
        in_specs=[
            pl.BlockSpec((1, kpad, M), lambda n: (n, 0, 0)),
            pl.BlockSpec(kp["conv_w"].shape, lambda n: (0, 0)),
            pl.BlockSpec(kp["conv_b"].shape, lambda n: (0, 0)),
            pl.BlockSpec(kp["fc1_w"].shape, lambda n: (0, 0, 0)),
            pl.BlockSpec(kp["fc1_b"].shape, lambda n: (0, 0)),
            pl.BlockSpec(kp["fc2_w"].shape, lambda n: (0, 0)),
            pl.BlockSpec(kp["fc2_b"].shape, lambda n: (0, 0)),
        ],
        out_specs=(
            pl.BlockSpec((1, ch, M), lambda n: (n, 0, 0)),
            pl.BlockSpec((1, 1, n_classes), lambda n: (n, 0, 0)),
        ),
        compiler_params=pltpu.CompilerParams(dimension_semantics=("parallel",)),
    )(patches, kp["conv_w"], kp["conv_b"], kp["fc1_w"], kp["fc1_b"],
      kp["fc2_w"], kp["fc2_b"])

    # PyTorch x.view(N, -1) on the NCHW feature map: feat is already
    # channel-major, so this is a zero-copy reshape (no transpose).
    flat = feat.reshape(N, ch * M)
    out = out3.reshape(N, n_classes)
    return out, flat


# ----------------------------------------------------------------------------
# Pure-JAX reference (direct translation of the module math, from RAW params)
# ----------------------------------------------------------------------------
def reference_forward(raw, x_nchw):
    a, b, g = A_CURV, B_RELOG, GAMMA
    N, C, H, W = x_nchw.shape
    hp = jax.lax.Precision.HIGHEST
    patches = jax.lax.conv_general_dilated_patches(
        x_nchw, (3, 3), (1, 1), ((1, 1), (1, 1)),
        precision=hp).reshape(N, 9 * C, H * W)
    lin = jnp.einsum('ok,nkm->nom', raw["conv_wl"], patches, precision=hp)
    quad = jnp.einsum('ok,nkm->nom', jnp.abs(raw["conv_wq"]),
                      patches * patches, precision=hp)
    z = lin - a * quad + a * g + raw["conv_b"][None, :, None]
    z = z.reshape(N, 4, 2, H * W).max(axis=2)                    # FoldingMaxout
    feat = jnp.log1p(b * jnp.maximum(z, 0.0)) / b                # ReLog
    flat = feat.reshape(N, -1)
    lin1 = jnp.dot(flat, raw["fc1_wl"].T, precision=hp)
    quad1 = jnp.dot(flat * flat, jnp.abs(raw["fc1_wq"]).T, precision=hp)
    h = lin1 - a * quad1 + a * g + raw["fc1_b"]
    h = h.reshape(N, 8, 2).max(axis=2)                           # FoldingMaxout
    r = jnp.log1p(b * jnp.maximum(h, 0.0)) / b                   # ReLog
    out = jnp.dot(r, raw["fc2_w"].T, precision=hp) + raw["fc2_b"]
    return out, flat


if __name__ == "__main__":
    key = jax.random.PRNGKey(0)
    kx, kparams = jax.random.split(key)
    N, C, H, W = 2, 4, 16, 16
    x = jax.random.normal(kx, (N, C, H, W), jnp.float32)          # NCHW like PyTorch

    raw = init_params(kparams, c_in=C, conv_out=8, h=H, w=W, hidden=16, n_classes=10)
    kp = prepare_params(raw)

    fwd = jax.jit(experimental_model_forward)
    out, flat = fwd(kp, x)
    jax.block_until_ready((out, flat))
    assert out.shape == (N, 10) and flat.shape == (N, (8 // 2) * H * W)

    # correctness check against the pure-JAX reference
    out_ref, flat_ref = reference_forward(raw, x)
    assert bool(jnp.allclose(flat, flat_ref, rtol=5e-2, atol=5e-2)), "flat mismatch"
    assert bool(jnp.allclose(out, out_ref, rtol=5e-2, atol=5e-2)), "out mismatch"
    print("KERNEL_OK")
</pallas_src>

<mosaic_0001>
module attributes {stable_mosaic.version = 11 : i64} {
  func.func @_fused_model_kernel(%arg0: i32, %arg1: memref<1x40x256xf32, #tpu.memory_space<vmem>>, %arg2: memref<8x80xf32, #tpu.memory_space<vmem>>, %arg3: memref<8x1xf32, #tpu.memory_space<vmem>>, %arg4: memref<4x512x16xf32, #tpu.memory_space<vmem>>, %arg5: memref<1x16xf32, #tpu.memory_space<vmem>>, %arg6: memref<8x10xf32, #tpu.memory_space<vmem>>, %arg7: memref<1x10xf32, #tpu.memory_space<vmem>>, %arg8: memref<1x4x256xf32, #tpu.memory_space<vmem>>, %arg9: memref<1x1x10xf32, #tpu.memory_space<vmem>>) attributes {dimension_semantics = [#tpu.dimension_semantics<parallel>], iteration_bounds = array<i64: 2>, scalar_prefetch = 0 : i64, scratch_operands = 0 : i64, tpu.core_type = #tpu.core_type<tc>, window_params = [{transform_indices = @transform_0, window_bounds = array<i64: 1, 40, 256>}, {pipeline_mode = #tpu.pipeline_mode<synchronous>, transform_indices = @transform_1, window_bounds = array<i64: 8, 80>}, {pipeline_mode = #tpu.pipeline_mode<synchronous>, transform_indices = @transform_2, window_bounds = array<i64: 8, 1>}, {pipeline_mode = #tpu.pipeline_mode<synchronous>, transform_indices = @transform_3, window_bounds = array<i64: 4, 512, 16>}, {pipeline_mode = #tpu.pipeline_mode<synchronous>, transform_indices = @transform_4, window_bounds = array<i64: 1, 16>}, {pipeline_mode = #tpu.pipeline_mode<synchronous>, transform_indices = @transform_5, window_bounds = array<i64: 8, 10>}, {pipeline_mode = #tpu.pipeline_mode<synchronous>, transform_indices = @transform_6, window_bounds = array<i64: 1, 10>}, {transform_indices = @transform_7, window_bounds = array<i64: 1, 4, 256>}, {transform_indices = @transform_8, window_bounds = array<i64: 1, 1, 10>}]} {
    %c0 = arith.constant 0 : index
    %c0_0 = arith.constant 0 : index
    %c0_1 = arith.constant 0 : index
    %0 = vector.load %arg1[%c0, %c0_0, %c0_1] : memref<1x40x256xf32, #tpu.memory_space<vmem>>, vector<1x40x256xf32>
    %1 = vector.shape_cast %0 : vector<1x40x256xf32> to vector<40x256xf32>
    %2 = arith.mulf %1, %1 : vector<40x256xf32>
    %3 = tpu.concatenate %1, %2 in 0 : vector<40x256xf32>, vector<40x256xf32> -> vector<80x256xf32>
    %c0_2 = arith.constant 0 : index
    %c0_3 = arith.constant 0 : index
    %4 = vector.load %arg2[%c0_2, %c0_3] : memref<8x80xf32, #tpu.memory_space<vmem>>, vector<8x80xf32>
    %cst = arith.constant dense<0.000000e+00> : vector<8x256xf32>
    %5 = tpu.matmul %4, %3, %cst {dimension_numbers = #tpu.dot_dimension_numbers<[1], [0], [0], [1], [0, 0, 1, 1], [], []>} : vector<8x80xf32>, vector<80x256xf32>, vector<8x256xf32> -> vector<8x256xf32>
    %c0_4 = arith.constant 0 : index
    %c0_5 = arith.constant 0 : index
    %6 = vector.load %arg3[%c0_4, %c0_5] : memref<8x1xf32, #tpu.memory_space<vmem>>, vector<8x1xf32>
    %7 = vector.broadcast %6 : vector<8x1xf32> to vector<8x256xf32>
    %8 = arith.addf %5, %7 : vector<8x256xf32>
    %9 = vector.extract_strided_slice %8 {offsets = [0, 0], sizes = [4, 256], strides = [1, 1]} : vector<8x256xf32> to vector<4x256xf32>
    %10 = vector.extract_strided_slice %8 {offsets = [4, 0], sizes = [4, 256], strides = [1, 1]} : vector<8x256xf32> to vector<4x256xf32>
    %11 = arith.maximumf %9, %10 : vector<4x256xf32>
    %cst_6 = arith.constant 0.000000e+00 : f32
    %12 = vector.broadcast %cst_6 : f32 to vector<4x256xf32>
    %13 = arith.maximumf %11, %12 : vector<4x256xf32>
    %cst_7 = arith.constant 1.000000e-03 : f32
    %14 = vector.broadcast %cst_7 : f32 to vector<4x256xf32>
    %15 = arith.mulf %14, %13 : vector<4x256xf32>
    %16 = math.log1p %15 : vector<4x256xf32>
    %cst_8 = arith.constant 1.000000e+03 : f32
    %17 = vector.broadcast %cst_8 : f32 to vector<4x256xf32>
    %18 = arith.mulf %16, %17 : vector<4x256xf32>
    %c0_9 = arith.constant 0 : index
    %c0_10 = arith.constant 0 : index
    %c0_11 = arith.constant 0 : index
    %19 = vector.load %arg8[%c0_9, %c0_10, %c0_11] : memref<1x4x256xf32, #tpu.memory_space<vmem>>, vector<1x4x256xf32>
    %20 = vector.shape_cast %19 : vector<1x4x256xf32> to vector<4x256xf32>
    %21 = vector.shape_cast %18 : vector<4x256xf32> to vector<1x4x256xf32>
    tpu.vector_store %arg8[%c0_9, %c0_10, %c0_11], %21 {strides = array<i32>} : memref<1x4x256xf32, #tpu.memory_space<vmem>>, vector<1x4x256xf32>,
    %22 = arith.mulf %18, %18 : vector<4x256xf32>
    %23 = tpu.concatenate %18, %22 in 1 : vector<4x256xf32>, vector<4x256xf32> -> vector<4x512xf32>
    %c0_12 = arith.constant 0 : index
    %c0_13 = arith.constant 0 : index
    %24 = vector.load %arg5[%c0_12, %c0_13] : memref<1x16xf32, #tpu.memory_space<vmem>>, vector<1x16xf32>
    %25 = vector.extract_strided_slice %23 {offsets = [0, 0], sizes = [1, 512], strides = [1, 1]} : vector<4x512xf32> to vector<1x512xf32>
    %c0_14 = arith.constant 0 : index
    %c0_15 = arith.constant 0 : index
    %c0_16 = arith.constant 0 : index
    %26 = vector.load %arg4[%c0_14, %c0_15, %c0_16] : memref<4x512x16xf32, #tpu.memory_space<vmem>>, vector<1x512x16xf32>
    %27 = vector.shape_cast %26 : vector<1x512x16xf32> to vector<512x16xf32>
    %cst_17 = arith.constant dense<0.000000e+00> : vector<1x16xf32>
    %28 = tpu.matmul %25, %27, %cst_17 {dimension_numbers = #tpu.dot_dimension_numbers<[1], [0], [0], [1], [0, 0, 1, 1], [], []>} : vector<1x512xf32>, vector<512x16xf32>, vector<1x16xf32> -> vector<1x16xf32>
    %29 = arith.addf %24, %28 : vector<1x16xf32>
    %30 = vector.extract_strided_slice %23 {offsets = [1, 0], sizes = [1, 512], strides = [1, 1]} : vector<4x512xf32> to vector<1x512xf32>
    %c1 = arith.constant 1 : index
    %c0_18 = arith.constant 0 : index
    %c0_19 = arith.constant 0 : index
    %31 = vector.load %arg4[%c1, %c0_18, %c0_19] : memref<4x512x16xf32, #tpu.memory_space<vmem>>, vector<1x512x16xf32>
    %32 = vector.shape_cast %31 : vector<1x512x16xf32> to vector<512x16xf32>
    %cst_20 = arith.constant dense<0.000000e+00> : vector<1x16xf32>
    %33 = tpu.matmul %30, %32, %cst_20 {dimension_numbers = #tpu.dot_dimension_numbers<[1], [0], [0], [1], [0, 0, 1, 1], [], []>} : vector<1x512xf32>, vector<512x16xf32>, vector<1x16xf32> -> vector<1x16xf32>
    %34 = arith.addf %29, %33 : vector<1x16xf32>
    %35 = vector.extract_strided_slice %23 {offsets = [2, 0], sizes = [1, 512], strides = [1, 1]} : vector<4x512xf32> to vector<1x512xf32>
    %c2 = arith.constant 2 : index
    %c0_21 = arith.constant 0 : index
    %c0_22 = arith.constant 0 : index
    %36 = vector.load %arg4[%c2, %c0_21, %c0_22] : memref<4x512x16xf32, #tpu.memory_space<vmem>>, vector<1x512x16xf32>
    %37 = vector.shape_cast %36 : vector<1x512x16xf32> to vector<512x16xf32>
    %cst_23 = arith.constant dense<0.000000e+00> : vector<1x16xf32>
    %38 = tpu.matmul %35, %37, %cst_23 {dimension_numbers = #tpu.dot_dimension_numbers<[1], [0], [0], [1], [0, 0, 1, 1], [], []>} : vector<1x512xf32>, vector<512x16xf32>, vector<1x16xf32> -> vector<1x16xf32>
    %39 = arith.addf %34, %38 : vector<1x16xf32>
    %40 = vector.extract_strided_slice %23 {offsets = [3, 0], sizes = [1, 512], strides = [1, 1]} : vector<4x512xf32> to vector<1x512xf32>
    %c3 = arith.constant 3 : index
    %c0_24 = arith.constant 0 : index
    %c0_25 = arith.constant 0 : index
    %41 = vector.load %arg4[%c3, %c0_24, %c0_25] : memref<4x512x16xf32, #tpu.memory_space<vmem>>, vector<1x512x16xf32>
    %42 = vector.shape_cast %41 : vector<1x512x16xf32> to vector<512x16xf32>
    %cst_26 = arith.constant dense<0.000000e+00> : vector<1x16xf32>
    %43 = tpu.matmul %40, %42, %cst_26 {dimension_numbers = #tpu.dot_dimension_numbers<[1], [0], [0], [1], [0, 0, 1, 1], [], []>} : vector<1x512xf32>, vector<512x16xf32>, vector<1x16xf32> -> vector<1x16xf32>
    %44 = arith.addf %39, %43 : vector<1x16xf32>
    %45 = vector.extract_strided_slice %44 {offsets = [0, 0], sizes = [1, 8], strides = [1, 1]} : vector<1x16xf32> to vector<1x8xf32>
    %46 = vector.extract_strided_slice %44 {offsets = [0, 8], sizes = [1, 8], strides = [1, 1]} : vector<1x16xf32> to vector<1x8xf32>
    %47 = arith.maximumf %45, %46 : vector<1x8xf32>
    %cst_27 = arith.constant 0.000000e+00 : f32
    %48 = vector.broadcast %cst_27 : f32 to vector<1x8xf32>
    %49 = arith.maximumf %47, %48 : vector<1x8xf32>
    %cst_28 = arith.constant 1.000000e-03 : f32
    %50 = vector.broadcast %cst_28 : f32 to vector<1x8xf32>
    %51 = arith.mulf %50, %49 : vector<1x8xf32>
    %52 = math.log1p %51 : vector<1x8xf32>
    %cst_29 = arith.constant 1.000000e+03 : f32
    %53 = vector.broadcast %cst_29 : f32 to vector<1x8xf32>
    %54 = arith.mulf %52, %53 : vector<1x8xf32>
    %c0_30 = arith.constant 0 : index
    %c0_31 = arith.constant 0 : index
    %55 = vector.load %arg6[%c0_30, %c0_31] : memref<8x10xf32, #tpu.memory_space<vmem>>, vector<8x10xf32>
    %cst_32 = arith.constant dense<0.000000e+00> : vector<1x10xf32>
    %56 = tpu.matmul %54, %55, %cst_32 {dimension_numbers = #tpu.dot_dimension_numbers<[1], [0], [0], [1], [0, 0, 1, 1], [], []>} : vector<1x8xf32>, vector<8x10xf32>, vector<1x10xf32> -> vector<1x10xf32>
    %c0_33 = arith.constant 0 : index
    %c0_34 = arith.constant 0 : index
    %57 = vector.load %arg7[%c0_33, %c0_34] : memref<1x10xf32, #tpu.memory_space<vmem>>, vector<1x10xf32>
    %58 = arith.addf %56, %57 : vector<1x10xf32>
    %c0_35 = arith.constant 0 : index
    %c0_36 = arith.constant 0 : index
    %c0_37 = arith.constant 0 : index
    %59 = vector.load %arg9[%c0_35, %c0_36, %c0_37] : memref<1x1x10xf32, #tpu.memory_space<vmem>>, vector<1x1x10xf32>
    %60 = vector.shape_cast %59 : vector<1x1x10xf32> to vector<1x10xf32>
    %61 = vector.shape_cast %58 : vector<1x10xf32> to vector<1x1x10xf32>
    tpu.vector_store %arg9[%c0_35, %c0_36, %c0_37], %61 {strides = array<i32>} : memref<1x1x10xf32, #tpu.memory_space<vmem>>, vector<1x1x10xf32>,
    return
  }
  func.func @transform_0(%arg0: i32) -> (i32, i32, i32) {
    %c0_i32 = arith.constant 0 : i32
    %c0_i32_0 = arith.constant 0 : i32
    %c0_i32_1 = arith.constant 0 : i32
    return %arg0, %c0_i32, %c0_i32_0 : i32, i32, i32
  }
  func.func @transform_1(%arg0: i32) -> (i32, i32) {
    %c0_i32 = arith.constant 0 : i32
    %c0_i32_0 = arith.constant 0 : i32
    %c0_i32_1 = arith.constant 0 : i32
    return %c0_i32, %c0_i32_0 : i32, i32
  }
  func.func @transform_2(%arg0: i32) -> (i32, i32) {
    %c0_i32 = arith.constant 0 : i32
    %c0_i32_0 = arith.constant 0 : i32
    %c0_i32_1 = arith.constant 0 : i32
    return %c0_i32, %c0_i32_0 : i32, i32
  }
  func.func @transform_3(%arg0: i32) -> (i32, i32, i32) {
    %c0_i32 = arith.constant 0 : i32
    %c0_i32_0 = arith.constant 0 : i32
    %c0_i32_1 = arith.constant 0 : i32
    %c0_i32_2 = arith.constant 0 : i32
    return %c0_i32, %c0_i32_0, %c0_i32_1 : i32, i32, i32
  }
  func.func @transform_4(%arg0: i32) -> (i32, i32) {
    %c0_i32 = arith.constant 0 : i32
    %c0_i32_0 = arith.constant 0 : i32
    %c0_i32_1 = arith.constant 0 : i32
    return %c0_i32, %c0_i32_0 : i32, i32
  }
  func.func @transform_5(%arg0: i32) -> (i32, i32) {
    %c0_i32 = arith.constant 0 : i32
    %c0_i32_0 = arith.constant 0 : i32
    %c0_i32_1 = arith.constant 0 : i32
    return %c0_i32, %c0_i32_0 : i32, i32
  }
  func.func @transform_6(%arg0: i32) -> (i32, i32) {
    %c0_i32 = arith.constant 0 : i32
    %c0_i32_0 = arith.constant 0 : i32
    %c0_i32_1 = arith.constant 0 : i32
    return %c0_i32, %c0_i32_0 : i32, i32
  }
  func.func @transform_7(%arg0: i32) -> (i32, i32, i32) {
    %c0_i32 = arith.constant 0 : i32
    %c0_i32_0 = arith.constant 0 : i32
    %c0_i32_1 = arith.constant 0 : i32
    return %arg0, %c0_i32, %c0_i32_0 : i32, i32, i32
  }
  func.func @transform_8(%arg0: i32) -> (i32, i32, i32) {
    %c0_i32 = arith.constant 0 : i32
    %c0_i32_0 = arith.constant 0 : i32
    %c0_i32_1 = arith.constant 0 : i32
    return %arg0, %c0_i32, %c0_i32_0 : i32, i32, i32
  }
}

</mosaic_0001>

<bundles_post_ra>
// kernel: experimental_model_forward.1
= control target key start
LH: loop header
LB: loop body
LE: loop exit
PB: predicated region body
PF: predicated region fallthrough
CT: control target
= control target key end

     0   :  { %14 = vsyncpa [#allocation3], 0  ;;  %s3359_s0 = inlined_call_operand.vmem [shape: f32[2,40,256], index: 0, kind: input, shape index: {}]   ;;  %s3360_s1 = inlined_call_operand.vmem [shape: f32[8,80], index: 1, kind: input, shape index: {}]   ;;  %s3361_s2 = inlined_call_operand.vmem [shape: f32[8,1], index: 2, kind: input, shape index: {}]   ;;  %s3362_s3 = inlined_call_operand.vmem [shape: f32[4,512,16], index: 3, kind: input, shape index: {}]   ;;  %s3363_s4 = inlined_call_operand.vmem [shape: f32[1,16], index: 4, kind: input, shape index: {}]   ;;  %s3364_s5 = inlined_call_operand.vmem [shape: f32[8,10], index: 5, kind: input, shape index: {}]   ;;  %s3365_s6 = inlined_call_operand.vmem [shape: f32[1,10], index: 6, kind: input, shape index: {}]   ;;  %s3366_s7 = inlined_call_operand.vmem [shape: f32[2,4,256], index: 7, kind: output, shape index: {0}]   ;;  %s3367_s8 = inlined_call_operand.hbm [shape: f32[2,1,10], index: 8, kind: output, shape index: {1}]  }
   0x1   :  { %16 = vsyncpa [#allocation3 + $0x1], 0  ;;  %s2436_s27 = smov 0   ;;  %s2438_s28 = smov 0  }
   0x2   :  { %s2440_s29 = smov 0   ;;  %s2442_s30 = smov 0  }
   0x3 LB: > { %s2457_s9 = sadd.s32 4294967295, %s2384_s30   ;;  %s1503_s10 = sadd.s32 4294967294, %s2384_s30   ;;  %s2384_s30 = sphi %s2442_s30, %s3373_s30   ;;  %s2380_s29 = sphi %s2440_s29, %s3372_s29   ;;  %s2376_s28 = sphi %s2438_s28, %s3371_s28   ;;  %s2372_s27 = sphi %s2436_s27, %s3370_s27  }
   0x4   : > { %s2461_s11 = sadd.s32 1, %s2384_s30   ;;  %s207_s12 = sadd.s32 1, %s2380_s29 }
   0x5   : > { %s204_s13 = ssub.s32 %s2384_s30, %s2461_s11  ;;  %p217_p0 = scmp.ne.s32.totalorder %s2380_s29, %s2376_s28 }
   0x6   : > { %p205_p1 = scmp.eq.s32.totalorder %s204_s13, 0  ;;  %p218_p2 = scmp.eq.s32.totalorder %s2457_s9, 1 }
   0x7   : > { %p223_p3 = scmp.ne.s32.totalorder %s2376_s28, %s2372_s27  ;;  %p224_p4 = scmp.eq.s32.totalorder %s1503_s10, 1 }
   0x8   : > { %s2472_s14 = scalar_select %p205_p1, %s2380_s29, %s207_s12  }
   0x9   : > { %p2474_p5 = por %p218_p2, %p217_p0  ;;  %p2478_p6 = por %p224_p4, %p223_p3 }
   0xa   : > { %p1506_p7 = scmp.ge.s32.totalorder %s2384_s30, 1  ;;  %p268_p8 = scmp.lt.s32.totalorder %s2384_s30, 3 }
   0xc   : > { %p269_p9 = pnand %p1506_p7, %p268_p8 }
   0xd   : > { %p306_p10 = scmp.lt.s32.totalorder (!%p269_p9), %s2457_s9, 1  ;;  %v337_v0 = vld [vmem:[%s3361_s2] sm:$0xff] (!%p269_p9)  ;;  %v2386_v1 = vmov (!%p269_p9), 0.0   ;;  %v2387_v2 = vmov (!%p269_p9), 0   ;;  %v475_v4 = vld [vmem:[%s3362_s3 + $0x88] sm:$0xff] (!%p269_p9)  ;;  %vm343_vm0 = vcmask (!%p269_p9), 654336  }
   0xe   : > { %272 = sbr.rel (%p269_p9) target bundleno = 975 (0x3cf), region = 48  ;;  %411 = vmatprep.mubr.f32.mxu0 (!%p269_p9), %v2386_v1  ;;  %2315 = vset.pattern.permute.xlu0 (!%p269_p9), %v2387_v2  ;;  %v474_v3 = vld [vmem:[%s3362_s3 + $0x80] sm:$0xff] (!%p269_p9)  ;;  %v459_v7 = vld [vmem:[%s3362_s3 + $0x8] sm:$0xff] (!%p269_p9)  ;;  %v476_v46 = vld [vmem:[%s3362_s3 + $0x90] sm:$0xff] (!%p269_p9)  ;;  %s2388_s23 = smov (!%p269_p9), 120   ;;  %vm2389_vm3 = vmmov (!%p269_p9), 0  }
   0xf   : > { %v458_v5 = vld [vmem:[%s3362_s3] sm:$0xff] (!%p269_p9)  ;;  %340 = vperm.xlu0 (!%p269_p9), %2315, %v337_v0   ;;  %v2015_v6 = vpack.c.bf16 (!%p269_p9), %v475_v4, %v474_v3  ;;  %v507_v41 = vld [vmem:[%s3362_s3 + $0x188] sm:$0xff] (!%p269_p9)  ;;  %v477_v47 = vld [vmem:[%s3362_s3 + $0x98] sm:$0xff] (!%p269_p9)  ;;  %vm1326_vm5 = vcmask (!%p269_p9), 64512   ;;  %vm1400_vm6 = vcmask (!%p269_p9), 73728  }
  0x10   : > { %v2017_v8 = vpack.c.bf16 (!%p269_p9), %v459_v7, %v458_v5  ;;  %v336_v39 = vld [vmem:[%s3360_s1] sm:$0xff] (!%p269_p9)  ;;  %v491_v44 = vld [vmem:[%s3362_s3 + $0x108] sm:$0xff] (!%p269_p9)  ;;  %v2019_v48 = vpack.c.bf16 (!%p269_p9), %v477_v47, %v476_v46  ;;  %v460_v49 = vld [vmem:[%s3362_s3 + $0x10] sm:$0xff] (!%p269_p9) }
  0x11   : > { %2016 = vmatprep.subr.bf16.mxu1 (!%p269_p9), %v2015_v6  ;;  %v506_v40 = vld [vmem:[%s3362_s3 + $0x180] sm:$0xff] (!%p269_p9)  ;;  %v461_v50 = vld [vmem:[%s3362_s3 + $0x18] sm:$0xff] (!%p269_p9)  ;;  %v508_v52 = vld [vmem:[%s3362_s3 + $0x190] sm:$0xff] (!%p269_p9) }
  0x12   : > { %2018 = vmatpush3.bf16.msra.mxu1 (!%p269_p9), %v2017_v8  ;;  %v2047_v42 = vpack.c.bf16 (!%p269_p9), %v507_v41, %v506_v40  ;;  %v490_v43 = vld [vmem:[%s3362_s3 + $0x100] sm:$0xff] (!%p269_p9)  ;;  %v2021_v51 = vpack.c.bf16 (!%p269_p9), %v461_v50, %v460_v49  ;;  %v509_v53 = vld [vmem:[%s3362_s3 + $0x198] sm:$0xff] (!%p269_p9)  ;;  %v492_v55 = vld [vmem:[%s3362_s3 + $0x110] sm:$0xff] (!%p269_p9) }
  0x13   : > { %v2049_v45 = vpack.c.bf16 (!%p269_p9), %v491_v44, %v490_v43  ;;  %2020 = vmatprep.subr.bf16.mxu1 (!%p269_p9), %v2019_v48  ;;  %v2051_v54 = vpack.c.bf16 (!%p269_p9), %v509_v53, %v508_v52  ;;  %v493_v56 = vld [vmem:[%s3362_s3 + $0x118] sm:$0xff] (!%p269_p9)  ;;  %v478_v58 = vld [vmem:[%s3362_s3 + $0xa0] sm:$0xff] (!%p269_p9)  ;;  %v479_v59 = vld [vmem:[%s3362_s3 + $0xa8] sm:$0xff] (!%p269_p9) }
  0x14   : > { %v2053_v57 = vpack.c.bf16 (!%p269_p9), %v493_v56, %v492_v55  ;;  %v2023_v60 = vpack.c.bf16 (!%p269_p9), %v479_v59, %v478_v58  ;;  %v462_v61 = vld [vmem:[%s3362_s3 + $0x20] sm:$0xff] (!%p269_p9)  ;;  %v463_v62 = vld [vmem:[%s3362_s3 + $0x28] sm:$0xff] (!%p269_p9)  ;;  %v480_v7 = vld [vmem:[%s3362_s3 + $0xb0] sm:$0xff] (!%p269_p9) }
  0x15   : > { %s2499_s25 = scalar_select %p306_p10, %s2457_s9, 1  ;;  %v2025_v63 = vpack.c.bf16 %v463_v62, %v462_v61  ;;  %v510_v0 = vld [vmem:[%s3362_s3 + $0x1a0] sm:$0xff]  ;;  %v511_v2 = vld [vmem:[%s3362_s3 + $0x1a8] sm:$0xff]  ;;  %v481_v8 = vld [vmem:[%s3362_s3 + $0xb8] sm:$0xff] }
  0x16   : > { %2022 = vmatpush3.bf16.msra.mxu1 %v2021_v51  ;;  %v2055_v3 = vpack.c.bf16 %v511_v2, %v510_v0  ;;  %v494_v4 = vld [vmem:[%s3362_s3 + $0x120] sm:$0xff]  ;;  %v495_v5 = vld [vmem:[%s3362_s3 + $0x128] sm:$0xff]  ;;  %v500_v40 = vld [vmem:[%s3362_s3 + $0x150] sm:$0xff] }
  0x17   : > { %s2271_s12 = smul.u32 80, %s2499_s25  ;;  %2024 = vmatprep.subr.bf16.mxu1 %v2023_v60  ;;  %v2057_v6 = vpack.c.bf16 %v495_v5, %v494_v4  ;;  %v501_v41 = vld [vmem:[%s3362_s3 + $0x158] sm:$0xff]  ;;  %v486_v43 = vld [vmem:[%s3362_s3 + $0xe0] sm:$0xff]  ;;  %v487_v44 = vld [vmem:[%s3362_s3 + $0xe8] sm:$0xff]  ;;  %s1707_s21 = sshll.u32 %s2499_s25, 3 }
  0x18   : > { %v470_v46 = vld [vmem:[%s3362_s3 + $0x60] sm:$0xff]  ;;  %v471_v47 = vld [vmem:[%s3362_s3 + $0x68] sm:$0xff]  ;;  %v488_v55 = vld [vmem:[%s3362_s3 + $0xf0] sm:$0xff]  ;;  %s315_s24 = scalar_lea.vmem %s3366_s7, %s1707_s21 }
  0x19   : > { %s310_s18 = scalar_lea.vmem %s3359_s0, %s2271_s12  ;;  %v2041_v48 = vpack.c.bf16 %v471_v47, %v470_v46  ;;  %v518_v49 = vld [vmem:[%s3362_s3 + $0x1e0] sm:$0xff]  ;;  %v519_v50 = vld [vmem:[%s3362_s3 + $0x1e8] sm:$0xff]  ;;  %v489_v56 = vld [vmem:[%s3362_s3 + $0xf8] sm:$0xff]  ;;  %s304_s12 = sand.u32 1, %s2376_s28  }
  0x1a   : > { %v317_v9 = vld [vmem:[%s310_s18 + $0x8] sm:$0xff]  ;;  %v319_v10 = vld [vmem:[%s310_s18 + $0x18] sm:$0xff]  ;;  %v316_v11 = vld [vmem:[%s310_s18] sm:$0xff]  ;;  %2026 = vmatpush3.bf16.msra.mxu1 %v2025_v63  ;;  %v2071_v51 = vpack.c.bf16 %v519_v50, %v518_v49  ;;  %s305_s17 = scalar_lea.vmem [#allocation2], %s304_s12  ;;  %s1408_s22 = scalar_lea.sflag [#allocation3], %s304_s12 }
  0x1b   : > { %v327_v12 = vmul.f32 %v317_v9, %v317_v9  ;;  %v1995_v13 = vpack.c.bf16 %v319_v10, %v317_v9  ;;  %v318_v14 = vld [vmem:[%s310_s18 + $0x10] sm:$0xff]  ;;  %v321_v15 = vld [vmem:[%s310_s18 + $0x28] sm:$0xff]  ;;  %v323_v16 = vld [vmem:[%s310_s18 + $0x38] sm:$0xff]  ;;  %v326_v22 = vmul.f32 %v316_v11, %v316_v11  ;;  %v329_v24 = vmul.f32 %v319_v10, %v319_v10  ;;  %s1423_s25 = sshll.u32 %s305_s17, 4  ;;  %s3319_s25 = int_to_ptr.vmem [resolvable:$true] %s1423_s25 }
  0x1c   : > { %v1997_v17 = vpack.c.bf16 %v318_v14, %v316_v11  ;;  %v1999_v18 = vpack.c.bf16 %v323_v16, %v321_v15  ;;  %v320_v19 = vld [vmem:[%s310_s18 + $0x20] sm:$0xff]  ;;  %v322_v20 = vld [vmem:[%s310_s18 + $0x30] sm:$0xff]  ;;  %v325_v21 = vld [vmem:[%s310_s18 + $0x48] sm:$0xff]  ;;  %v331_v27 = vmul.f32 %v321_v15, %v321_v15  ;;  %v328_v28 = vmul.f32 %v318_v14, %v318_v14 }
  0x1d   : > { %1996 = vmatprep.subr.bf16.mxu0 %v1995_v13  ;;  %v2001_v23 = vpack.c.bf16 %v322_v20, %v320_v19  ;;  %v2003_v25 = vpack.c.bf16 %v327_v12, %v325_v21  ;;  %v324_v26 = vld [vmem:[%s310_s18 + $0x40] sm:$0xff]  ;;  %v330_v30 = vmul.f32 %v320_v19, %v320_v19  ;;  %v333_v32 = vmul.f32 %v323_v16, %v323_v16  ;;  %v464_v10 = vld [vmem:[%s3362_s3 + $0x30] sm:$0xff]  ;;  %v465_v11 = vld [vmem:[%s3362_s3 + $0x38] sm:$0xff] }
  0x1e   : > { %1998 = vmatpush1.bf16.msra.mxu0 %v1997_v17  ;;  %v2005_v29 = vpack.c.bf16 %v326_v22, %v324_v26  ;;  %v2007_v31 = vpack.c.bf16 %v331_v27, %v329_v24  ;;  %v335_v33 = vmul.f32 %v325_v21, %v325_v21  ;;  %v332_v35 = vmul.f32 %v322_v20, %v322_v20  ;;  %v512_v13 = vld [vmem:[%s3362_s3 + $0x1b0] sm:$0xff]  ;;  %v513_v14 = vld [vmem:[%s3362_s3 + $0x1b8] sm:$0xff]  ;;  %v482_v19 = vld [vmem:[%s3362_s3 + $0xc0] sm:$0xff] }
  0x1f   : > { %2000 = vmatprep.subr.bf16.mxu0 %v1999_v18  ;;  %v2009_v34 = vpack.c.bf16 %v330_v30, %v328_v28  ;;  %v334_v36 = vmul.f32 %v324_v26, %v324_v26  ;;  %v2027_v9 = vpack.c.bf16 %v481_v8, %v480_v7  ;;  %v2029_v12 = vpack.c.bf16 %v465_v11, %v464_v10  ;;  %v496_v16 = vld [vmem:[%s3362_s3 + $0x130] sm:$0xff]  ;;  %v497_v17 = vld [vmem:[%s3362_s3 + $0x138] sm:$0xff]  ;;  %v483_v20 = vld [vmem:[%s3362_s3 + $0xc8] sm:$0xff] }
  0x20   : > { %v2011_v37 = vpack.c.bf16 %v335_v33, %v333_v32  ;;  %v2059_v15 = vpack.c.bf16 %v513_v14, %v512_v13  ;;  %v2061_v18 = vpack.c.bf16 %v497_v17, %v496_v16  ;;  %v2031_v21 = vpack.c.bf16 %v483_v20, %v482_v19  ;;  %v466_v22 = vld [vmem:[%s3362_s3 + $0x40] sm:$0xff]  ;;  %v515_v26 = vld [vmem:[%s3362_s3 + $0x1c8] sm:$0xff]  ;;  %v485_v32 = vld [vmem:[%s3362_s3 + $0xd8] sm:$0xff] }
  0x21   : > { %v2013_v38 = vpack.c.bf16 %v334_v36, %v332_v35  ;;  %2028 = vmatprep.subr.bf16.mxu1 %v2027_v9  ;;  %v498_v28 = vld [vmem:[%s3362_s3 + $0x140] sm:$0xff]  ;;  %v469_v35 = vld [vmem:[%s3362_s3 + $0x58] sm:$0xff]  ;;  %v503_v53 = vld [vmem:[%s3362_s3 + $0x168] sm:$0xff] }
  0x22   : > { %2002 = vmatpush1.bf16.msra.mxu0 %v2001_v23  ;;  %2030 = vmatpush3.bf16.msra.mxu1 %v2029_v12  ;;  %v467_v23 = vld [vmem:[%s3362_s3 + $0x48] sm:$0xff]  ;;  %v502_v52 = vld [vmem:[%s3362_s3 + $0x160] sm:$0xff]  ;;  %v472_v58 = vld [vmem:[%s3362_s3 + $0x70] sm:$0xff] }
  0x23   : > { %2004 = vmatprep.subr.bf16.mxu0 %v2003_v25  ;;  %v2033_v24 = vpack.c.bf16 %v467_v23, %v466_v22  ;;  %v514_v25 = vld [vmem:[%s3362_s3 + $0x1c0] sm:$0xff]  ;;  %2032 = vmatprep.subr.bf16.mxu1 %v2031_v21  ;;  %v473_v59 = vld [vmem:[%s3362_s3 + $0x78] sm:$0xff]  ;;  %v520_v61 = vld [vmem:[%s3362_s3 + $0x1f0] sm:$0xff] }
  0x24   : > { %v2063_v27 = vpack.c.bf16 %v515_v26, %v514_v25  ;;  %v2045_v60 = vpack.c.bf16 %v473_v59, %v472_v58  ;;  %v521_v62 = vld [vmem:[%s3362_s3 + $0x1f8] sm:$0xff]  ;;  %v504_v0 = vld [vmem:[%s3362_s3 + $0x170] sm:$0xff]  ;;  %v1527_v4 = vld [vmem:[%s3362_s3 + $0x280] sm:$0xff] }
  0x25   : > { %v2075_v63 = vpack.c.bf16 %v521_v62, %v520_v61  ;;  %v505_v2 = vld [vmem:[%s3362_s3 + $0x178] sm:$0xff]  ;;  %v1528_v5 = vld [vmem:[%s3362_s3 + $0x288] sm:$0xff]  ;;  %v1559_v7 = vld [vmem:[%s3362_s3 + $0x380] sm:$0xff] }
  0x26   : > { %2006 = vmatpush1.bf16.msra.mxu0 %v2005_v29  ;;  %v499_v29 = vld [vmem:[%s3362_s3 + $0x148] sm:$0xff]  ;;  %2034 = vmatpush3.bf16.msra.mxu1 %v2033_v24  ;;  %v1562_v49 = vld [vmem:[%s3362_s3 + $0x398] sm:$0xff]  ;;  %v1545_v61 = vld [vmem:[%s3362_s3 + $0x310] sm:$0xff] }
  0x27   : > { %2008 = vmatprep.subr.bf16.mxu0 %v2007_v31  ;;  %v2065_v30 = vpack.c.bf16 %v499_v29, %v498_v28  ;;  %v484_v31 = vld [vmem:[%s3362_s3 + $0xd0] sm:$0xff]  ;;  %v1560_v8 = vld [vmem:[%s3362_s3 + $0x388] sm:$0xff]  ;;  %v1546_v62 = vld [vmem:[%s3362_s3 + $0x318] sm:$0xff] }
  0x28   : > { %v2035_v33 = vpack.c.bf16 %v485_v32, %v484_v31  ;;  %v2111_v9 = vpack.c.bf16 %v1560_v8, %v1559_v7  ;;  %v1532_v58 = vld [vmem:[%s3362_s3 + $0x2a8] sm:$0xff]  ;;  %v2117_v7 = vpack.c.bf16 %v1546_v62, %v1545_v61  ;;  %v1533_v8 = vld [vmem:[%s3362_s3 + $0x2b0] sm:$0xff]  ;;  %v1542_v61 = vld [vmem:[%s3362_s3 + $0x2f8] sm:$0xff] }
  0x2a   : > { %2010 = vmatpush1.bf16.msra.mxu0 %v2009_v34  ;;  %v468_v34 = vld [vmem:[%s3362_s3 + $0x50] sm:$0xff]  ;;  %2036 = vmatprep.subr.bf16.mxu1 %v2035_v33 }
  0x2b   : > { %2012 = vmatprep.subr.bf16.mxu0 %v2011_v37  ;;  %v2037_v36 = vpack.c.bf16 %v469_v35, %v468_v34  ;;  %v516_v37 = vld [vmem:[%s3362_s3 + $0x1d0] sm:$0xff] }
  0x2d   : > { %2038 = vmatpush3.bf16.msra.mxu1 %v2037_v36 }
  0x2e   : > { %2014 = vmatpush1.bf16.msra.mxu0 %v2013_v38  ;;  %v517_v38 = vld [vmem:[%s3362_s3 + $0x1d8] sm:$0xff] }
  0x2f   : > { %2048 = vmatprep.subr.bf16.mxu0 %v2047_v42  ;;  %v2069_v42 = vpack.c.bf16 %v501_v41, %v500_v40  ;;  %v1543_v40 = vld [vmem:[%s3362_s3 + $0x300] sm:$0xff]  ;;  %v1544_v41 = vld [vmem:[%s3362_s3 + $0x308] sm:$0xff] }
  0x30   : > { %v2113_v50 = vpack.c.bf16 %v1544_v41, %v1543_v40  ;;  %v1521_v41 = vld [vmem:[%s3362_s3 + $0x250] sm:$0xff] }
  0x31   : > { %1510 = vmatmul.mubr.msk.f32.vlgmr.msra.gmra.mrb[0].mxu0 %vm343_vm0, %v336_v39  ;;  %v2067_v39 = vpack.c.bf16 %v517_v38, %v516_v37  ;;  %v1511_v37 = vld [vmem:[%s3362_s3 + $0x200] sm:$0xff]  ;;  %v1512_v38 = vld [vmem:[%s3362_s3 + $0x208] sm:$0xff] }
  0x32   : > { %2050 = vmatpush3.bf16.msra.mxu0 %v2049_v45  ;;  %v2039_v45 = vpack.c.bf16 %v487_v44, %v486_v43  ;;  %v1529_v44 = vld [vmem:[%s3362_s3 + $0x290] sm:$0xff]  ;;  %v2081_v47 = vpack.c.bf16 %v1512_v38, %v1511_v37 }
  0x33   : > { %2052 = vmatprep.subr.bf16.mxu0 %v2051_v54  ;;  %v2073_v54 = vpack.c.bf16 %v503_v53, %v502_v52  ;;  %v1514_v52 = vld [vmem:[%s3362_s3 + $0x218] sm:$0xff]  ;;  %v1569_v38 = vld [vmem:[%s3362_s3 + $0x3d0] sm:$0xff] }
  0x34   : > { %2040 = vmatprep.subr.bf16.mxu1 %v2039_v45  ;;  %v1530_v45 = vld [vmem:[%s3362_s3 + $0x298] sm:$0xff] }
  0x35   : > { %2042 = vmatpush3.bf16.msra.mxu1 %v2041_v48  ;;  %v1561_v48 = vld [vmem:[%s3362_s3 + $0x390] sm:$0xff] }
  0x36   : > { %2054 = vmatpush3.bf16.msra.mxu0 %v2053_v57  ;;  %v2043_v57 = vpack.c.bf16 %v489_v56, %v488_v55  ;;  %v2083_v56 = vpack.c.bf16 %v1530_v45, %v1529_v44  ;;  %v1539_v45 = vld [vmem:[%s3362_s3 + $0x2e0] sm:$0xff] }
  0x37   : > { %2056 = vmatprep.subr.bf16.mxu0 %v2055_v3  ;;  %v2077_v3 = vpack.c.bf16 %v505_v2, %v504_v0  ;;  %v1563_v2 = vld [vmem:[%s3362_s3 + $0x3a0] sm:$0xff] }
  0x38   : > { %2044 = vmatprep.subr.bf16.mxu1 %v2043_v57  ;;  %v1531_v57 = vld [vmem:[%s3362_s3 + $0x2a0] sm:$0xff] }
  0x39   : > { %2046 = vmatpush3.bf16.msra.mxu1 %v2045_v60  ;;  %v2115_v60 = vpack.c.bf16 %v1562_v49, %v1561_v48  ;;  %v1553_v49 = vld [vmem:[%s3362_s3 + $0x350] sm:$0xff] }
  0x3a   : > { %2058 = vmatpush3.bf16.msra.mxu0 %v2057_v6  ;;  %v2079_v6 = vpack.c.bf16 %v1528_v5, %v1527_v4  ;;  %v2087_v4 = vpack.c.bf16 %v1532_v58, %v1531_v57  ;;  %v1515_v5 = vld [vmem:[%s3362_s3 + $0x220] sm:$0xff]  ;;  %v1524_v57 = vld [vmem:[%s3362_s3 + $0x268] sm:$0xff] }
  0x3b   : > { %2060 = vmatprep.subr.bf16.mxu0 %v2059_v15 }
  0x3c   : > { %2080 = vmatprep.subr.bf16.mxu1 %v2079_v6  ;;  %v1516_v6 = vld [vmem:[%s3362_s3 + $0x228] sm:$0xff] }
  0x3e   : > { %2062 = vmatpush3.bf16.msra.mxu0 %v2061_v18 }
  0x3f   : > { %2064 = vmatprep.subr.bf16.mxu0 %v2063_v27 }
  0x42   : > { %2066 = vmatpush3.bf16.msra.mxu0 %v2065_v30 }
  0x43   : > { %2068 = vmatprep.subr.bf16.mxu0 %v2067_v39 }
  0x46   : > { %2070 = vmatpush3.bf16.msra.mxu0 %v2069_v42 }
  0x47   : > { %2072 = vmatprep.subr.bf16.mxu0 %v2071_v51  ;;  %v1513_v51 = vld [vmem:[%s3362_s3 + $0x210] sm:$0xff] }
  0x48   : > { %v2085_v0 = vpack.c.bf16 %v1514_v52, %v1513_v51  ;;  %v1571_v52 = vld [vmem:[%s3362_s3 + $0x3e0] sm:$0xff] }
  0x4a   : > { %2074 = vmatpush3.bf16.msra.mxu0 %v2073_v54 }
  0x4b   : > { %2076 = vmatprep.subr.bf16.mxu0 %v2075_v63 }
  0x4e   : > { %2078 = vmatpush3.bf16.msra.mxu0 %v2077_v3  ;;  %v1564_v3 = vld [vmem:[%s3362_s3 + $0x3a8] sm:$0xff] }
  0x4f   : > { %2112 = vmatprep.subr.bf16.mxu0 %v2111_v9  ;;  %v1534_v9 = vld [vmem:[%s3362_s3 + $0x2b8] sm:$0xff] }
  0x8e   : > { %v341_v10 = vpop.permute.xlu0 %340 }
 0x104   : > { %v413_v11 = vpop.f32.mrb[0].mxu0 }
 0x105   : > { %v414_v12 = vadd.f32 %v413_v11, %v341_v10  ;;  %v415_v13 = vpop.f32.mrb[1].mxu0  ;;  %v1547_v11 = vld [vmem:[%s3362_s3 + $0x320] sm:$0xff] }
 0x106   : > { %v416_v14 = vadd.f32 %v415_v13, %v341_v10  ;;  %v2119_v10 = vpack.c.bf16 %v1564_v3, %v1563_v2  ;;  %v2089_v13 = vpack.c.bf16 %v1516_v6, %v1515_v5  ;;  %v1573_v3 = vld [vmem:[%s3362_s3 + $0x3f0] sm:$0xff] }
 0x107   : > { %v420_v15 = vrot.slane %v414_v12, 4  ;;  %v1525_v6 = vld [vmem:[%s3362_s3 + $0x270] sm:$0xff] }
 0x108   : > { %v421_v16 = vrot.slane %v416_v14, 4 }
 0x109   : > { %v424_v17 = vmax.f32 %v414_v12, %v420_v15  ;;  %v1548_v12 = vld [vmem:[%s3362_s3 + $0x328] sm:$0xff]  ;;  %v1566_v15 = vld [vmem:[%s3362_s3 + $0x3b8] sm:$0xff] }
 0x10a   : > { %v425_v18 = vmax.f32 %v416_v14, %v421_v16  ;;  %v1565_v14 = vld [vmem:[%s3362_s3 + $0x3b0] sm:$0xff]  ;;  %v2091_v16 = vpack.c.bf16 %v1534_v9, %v1533_v8  ;;  %v1591_v9 = vld [vmem:[%s3362_s3 + $0x480] sm:$0xff] }
 0x10b   : > { %v426_v19 = vmax.f32 %v424_v17, 0.0  ;;  %v1517_v17 = vld [vmem:[%s3362_s3 + $0x230] sm:$0xff] }
 0x10c   : > { %v427_v20 = vmax.f32 %v425_v18, 0.0  ;;  %v1518_v18 = vld [vmem:[%s3362_s3 + $0x238] sm:$0xff] }
 0x10d   : > { %v428_v21 = vmul.f32 0.001, %v426_v19  ;;  %v2121_v19 = vpack.c.bf16 %v1548_v12, %v1547_v11  ;;  %v1557_v12 = vld [vmem:[%s3362_s3 + $0x370] sm:$0xff] }
 0x10e   : > { %v429_v22 = vmul.f32 0.001, %v427_v20  ;;  %v1535_v20 = vld [vmem:[%s3362_s3 + $0x2c0] sm:$0xff] }
 0x10f   : > { %v430_v23 = vadd.f32 1.0, %v428_v21  ;;  %v433_v25 = vmul.f32 -0.5, %v428_v21  ;;  %v436_v28 = vand.u32 2147483647, %v428_v21 }
 0x110   : > { %v439_v24 = vadd.f32 1.0, %v429_v22  ;;  %v442_v26 = vmul.f32 -0.5, %v429_v22  ;;  %v445_v30 = vand.u32 2147483647, %v429_v22 }
 0x111   : > { %2316 = vlog2.f32 %v430_v23  ;;  %v434_v27 = vadd.f32 1.0, %v433_v25  ;;  %vm437_vm1 = vcmp.lt.f32.partialorder %v436_v28, 0.0004427343  ;;  %v1549_v23 = vld [vmem:[%s3362_s3 + $0x330] sm:$0xff]  ;;  %v2093_v25 = vpack.c.bf16 %v1518_v18, %v1517_v17  ;;  %v1575_v18 = vld [vmem:[%s3362_s3 + $0x400] sm:$0xff] }
 0x112   : > { %2318 = vlog2.f32 %v439_v24  ;;  %v443_v29 = vadd.f32 1.0, %v442_v26  ;;  %vm446_vm2 = vcmp.lt.f32.partialorder %v445_v30, 0.0004427343  ;;  %v1550_v24 = vld [vmem:[%s3362_s3 + $0x338] sm:$0xff]  ;;  %v1567_v26 = vld [vmem:[%s3362_s3 + $0x3c0] sm:$0xff]  ;;  %v1520_v30 = vld [vmem:[%s3362_s3 + $0x248] sm:$0xff] }
 0x113   : > { %v435_v34 = vmul.f32 %v434_v27, %v428_v21  ;;  %v1536_v21 = vld [vmem:[%s3362_s3 + $0x2c8] sm:$0xff] }
 0x114   : > { %v444_v36 = vmul.f32 %v443_v29, %v429_v22  ;;  %v2123_v22 = vpack.c.bf16 %v1566_v15, %v1565_v14  ;;  %v1568_v27 = vld [vmem:[%s3362_s3 + $0x3c8] sm:$0xff]  ;;  %v2095_v28 = vpack.c.bf16 %v1536_v21, %v1535_v20  ;;  %v1519_v29 = vld [vmem:[%s3362_s3 + $0x240] sm:$0xff]  ;;  %v1593_v21 = vld [vmem:[%s3362_s3 + $0x490] sm:$0xff] }
 0x115   : > { %v2097_v37 = vpack.c.bf16 %v1520_v30, %v1519_v29  ;;  %v1623_v15 = vld [vmem:[%s3362_s3 + $0x580] sm:$0xff] }
 0x11b   : > { %v2317_v31 = vpop.eup %2316 }
 0x11c   : > { %v2319_v32 = vpop.eup %2318  ;;  %v432_v33 = vmul.f32 0.6931472, %v2317_v31  ;;  %v2125_v31 = vpack.c.bf16 %v1550_v24, %v1549_v23  ;;  %v1607_v24 = vld [vmem:[%s3362_s3 + $0x500] sm:$0xff] }
 0x11d   : > { %v441_v35 = vmul.f32 0.6931472, %v2319_v32  ;;  %v1537_v32 = vld [vmem:[%s3362_s3 + $0x2d0] sm:$0xff] }
 0x11e   : > { %v438_v39 = vsel %vm437_vm1, %v435_v34, %v432_v33  ;;  %v1538_v33 = vld [vmem:[%s3362_s3 + $0x2d8] sm:$0xff]  ;;  %v2127_v34 = vpack.c.bf16 %v1568_v27, %v1567_v26  ;;  %v1625_v27 = vld [vmem:[%s3362_s3 + $0x590] sm:$0xff] }
 0x11f   : > { %v2716_v42 = vmul.f32 1000.0, %v438_v39  ;;  %v447_v43 = vsel %vm446_vm2, %v444_v36, %v441_v35  ;;  %v1551_v35 = vld [vmem:[%s3362_s3 + $0x340] sm:$0xff]  ;;  %v1552_v36 = vld [vmem:[%s3362_s3 + $0x348] sm:$0xff]  ;;  %v1570_v39 = vld [vmem:[%s3362_s3 + $0x3d8] sm:$0xff]  ;;  %v2099_v40 = vpack.c.bf16 %v1538_v33, %v1537_v32 }
 0x120   : > { %v2724_v46 = vmul.f32 1000.0, %v447_v43  ;;  %v1522_v43 = vld [vmem:[%s3362_s3 + $0x258] sm:$0xff]  ;;  %v2129_v44 = vpack.c.bf16 %v1552_v36, %v1551_v35  ;;  %v2131_v48 = vpack.c.bf16 %v1570_v39, %v1569_v38  ;;  %v1595_v35 = vld [vmem:[%s3362_s3 + $0x4a0] sm:$0xff]  ;;  %v1596_v36 = vld [vmem:[%s3362_s3 + $0x4a8] sm:$0xff] }
 0x121   : > { %v2758_v59 = vmul.f32 %v2716_v42, %v2716_v42  ;;  %v2101_v51 = vpack.c.bf16 %v1522_v43, %v1521_v41  ;;  %v730_v29 = vrot.slane %v2716_v42, 1  ;;  %v1578_v32 = vld [vmem:[%s3362_s3 + $0x418] sm:$0xff]  ;;  %v1609_v39 = vld [vmem:[%s3362_s3 + $0x510] sm:$0xff] }
 0x122   : > { %v452_v53 = vcombine.low %v2716_v42, %v2724_v46  ;;  %586 = vmatprep.mubr.f32.mxu1 %v2724_v46  ;;  %v2746_v54 = vmul.f32 %v2724_v46, %v2724_v46  ;;  %v731_v55 = vrot.slane %v2724_v46, 1  ;;  %v945_v33 = vrot.slane %v2724_v46, 2 }
 0x123   : > { %587 = vmatmul.mubr.f32.vlgmr.msra.gmra.mrb[0].mxu1 %v2716_v42 }
 0x124   : > { %454 = vst [vmem:[%s315_s24] sm:$0xff] %v452_v53  ;;  %2082 = vmatpush3.bf16.msra.mxu1 %v2081_v47  ;;  %656 = vmatprep.mubr.f32.mxu0 %v2746_v54  ;;  %v733_v63 = vrot.slane %v2746_v54, 1  ;;  %v1540_v47 = vld [vmem:[%s3362_s3 + $0x2e8] sm:$0xff]  ;;  %v947_v41 = vrot.slane %v2746_v54, 2  ;;  %s1704_s24 = sshll.u32 %s2457_s9, 4  ;;  %s2390_s9 = smov [#allocation2]  }
 0x125   : > { %802 = vmatprep.mubr.f32.mxu1 %v731_v55  ;;  %657 = vmatmul.mubr.f32.vlgmr.msra.gmra.mrb[2].mxu0 %v2758_v59  ;;  %v1572_v53 = vld [vmem:[%s3362_s3 + $0x3e8] sm:$0xff]  ;;  %v2103_v55 = vpack.c.bf16 %v1540_v47, %v1539_v45  ;;  %v2151_v47 = vpack.c.bf16 %v1596_v36, %v1595_v35  ;;  %v1587_v35 = vld [vmem:[%s3362_s3 + $0x460] sm:$0xff]  ;;  %s3317_s20 = scalar_lea.hbm %s3367_s8, %s1704_s24  ;;  %s2326_s26 = sshll.u32 %s2390_s9, 4  ;;  %s2327_s26 = int_to_ptr.vmem [resolvable:$false] %s2326_s26 }
 0x126   : > { %2114 = vmatpush3.bf16.msra.mxu0 %v2113_v50  ;;  %2084 = vmatprep.subr.bf16.mxu1 %v2083_v56  ;;  %v1554_v50 = vld [vmem:[%s3362_s3 + $0x358] sm:$0xff]  ;;  %v1523_v56 = vld [vmem:[%s3362_s3 + $0x260] sm:$0xff]  ;;  %v2135_v62 = vpack.c.bf16 %v1572_v53, %v1571_v52  ;;  %v1628_v45 = vld [vmem:[%s3362_s3 + $0x5a8] sm:$0xff]  ;;  %s2328_s10 = scalar_lea.vmem %s2327_s26, 32  ;;  %p2329_p0 = scmp.lt.s32.totalorder %s3319_s25, %s2327_s26 }
 0x127   : > { %872 = vmatprep.mubr.f32.mxu0 %v733_v63  ;;  %2116 = vmatprep.subr.bf16.mxu0 %v2115_v60  ;;  %v2133_v58 = vpack.c.bf16 %v1554_v50, %v1553_v49  ;;  %v1541_v60 = vld [vmem:[%s3362_s3 + $0x2f0] sm:$0xff]  ;;  %v1555_v63 = vld [vmem:[%s3362_s3 + $0x360] sm:$0xff]  ;;  %v2105_v2 = vpack.c.bf16 %v1524_v57, %v1523_v56  ;;  %v1580_v49 = vld [vmem:[%s3362_s3 + $0x428] sm:$0xff] }
 0x128   : > { %2086 = vmatpush3.bf16.msra.mxu1 %v2085_v0  ;;  %v1556_v0 = vld [vmem:[%s3362_s3 + $0x368] sm:$0xff]  ;;  %v2107_v5 = vpack.c.bf16 %v1542_v61, %v1541_v60  ;;  %v1598_v52 = vld [vmem:[%s3362_s3 + $0x4b8] sm:$0xff] }
 0x129   : > { %2088 = vmatprep.subr.bf16.mxu1 %v2087_v4  ;;  %v1574_v4 = vld [vmem:[%s3362_s3 + $0x3f8] sm:$0xff]  ;;  %v2137_v8 = vpack.c.bf16 %v1556_v0, %v1555_v63  ;;  %v1612_v56 = vld [vmem:[%s3362_s3 + $0x528] sm:$0xff] }
 0x12a   : > { %2118 = vmatpush3.bf16.msra.mxu0 %v2117_v7  ;;  %v1526_v7 = vld [vmem:[%s3362_s3 + $0x278] sm:$0xff]  ;;  %v2139_v11 = vpack.c.bf16 %v1574_v4, %v1573_v3  ;;  %v1600_v3 = vld [vmem:[%s3362_s3 + $0x4c8] sm:$0xff] }
 0x12b   : > { %2120 = vmatprep.subr.bf16.mxu0 %v2119_v10  ;;  %v1592_v10 = vld [vmem:[%s3362_s3 + $0x488] sm:$0xff]  ;;  %v2109_v14 = vpack.c.bf16 %v1526_v7, %v1525_v6  ;;  %v1630_v60 = vld [vmem:[%s3362_s3 + $0x5b8] sm:$0xff] }
 0x12c   : > { %2090 = vmatpush3.bf16.msra.mxu1 %v2089_v13  ;;  %v1558_v13 = vld [vmem:[%s3362_s3 + $0x378] sm:$0xff]  ;;  %v2143_v17 = vpack.c.bf16 %v1592_v10, %v1591_v9  ;;  %v1632_v9 = vld [vmem:[%s3362_s3 + $0x5c8] sm:$0xff] }
 0x12d   : > { %2092 = vmatprep.subr.bf16.mxu1 %v2091_v16  ;;  %v1624_v16 = vld [vmem:[%s3362_s3 + $0x588] sm:$0xff]  ;;  %v2141_v20 = vpack.c.bf16 %v1558_v13, %v1557_v12  ;;  %v1582_v63 = vld [vmem:[%s3362_s3 + $0x438] sm:$0xff] }
 0x12e   : > { %2122 = vmatpush3.bf16.msra.mxu0 %v2121_v19  ;;  %v1576_v19 = vld [vmem:[%s3362_s3 + $0x408] sm:$0xff]  ;;  %v2175_v23 = vpack.c.bf16 %v1624_v16, %v1623_v15  ;;  %v1614_v6 = vld [vmem:[%s3362_s3 + $0x538] sm:$0xff] }
 0x12f   : > { %2124 = vmatprep.subr.bf16.mxu0 %v2123_v22  ;;  %v1594_v22 = vld [vmem:[%s3362_s3 + $0x498] sm:$0xff]  ;;  %v2145_v26 = vpack.c.bf16 %v1576_v19, %v1575_v18  ;;  %v1584_v12 = vld [vmem:[%s3362_s3 + $0x448] sm:$0xff] }
 0x130   : > { %2094 = vmatpush3.bf16.msra.mxu1 %v2093_v25  ;;  %v1608_v25 = vld [vmem:[%s3362_s3 + $0x508] sm:$0xff]  ;;  %v2147_v30 = vpack.c.bf16 %v1594_v22, %v1593_v21  ;;  %v1602_v15 = vld [vmem:[%s3362_s3 + $0x4d8] sm:$0xff] }
 0x131   : > { %2096 = vmatprep.subr.bf16.mxu1 %v2095_v28  ;;  %v1626_v28 = vld [vmem:[%s3362_s3 + $0x598] sm:$0xff]  ;;  %v1616_v18 = vld [vmem:[%s3362_s3 + $0x548] sm:$0xff] }
 0x132   : > { %2126 = vmatpush3.bf16.msra.mxu0 %v2125_v31  ;;  %v1577_v31 = vld [vmem:[%s3362_s3 + $0x410] sm:$0xff]  ;;  %v2179_v38 = vpack.c.bf16 %v1626_v28, %v1625_v27  ;;  %v1634_v21 = vld [vmem:[%s3362_s3 + $0x5d8] sm:$0xff]  ;;  %v1604_v27 = vld [vmem:[%s3362_s3 + $0x4e8] sm:$0xff] }
 0x133   : > { %2128 = vmatprep.subr.bf16.mxu0 %v2127_v34  ;;  %v2177_v34 = vpack.c.bf16 %v1608_v25, %v1607_v24  ;;  %v2149_v43 = vpack.c.bf16 %v1578_v32, %v1577_v31  ;;  %v1586_v24 = vld [vmem:[%s3362_s3 + $0x458] sm:$0xff]  ;;  %v1635_v32 = vld [vmem:[%s3362_s3 + $0x5e0] sm:$0xff]  ;;  %v1588_v36 = vld [vmem:[%s3362_s3 + $0x468] sm:$0xff] }
 0x134   : > { %2098 = vmatpush3.bf16.msra.mxu1 %v2097_v37  ;;  %v732_v37 = vrot.slane %v2758_v59, 1 }
 0x135   : > { %2100 = vmatprep.subr.bf16.mxu1 %v2099_v40  ;;  %v1610_v40 = vld [vmem:[%s3362_s3 + $0x518] sm:$0xff] }
 0x136   : > { %2130 = vmatpush3.bf16.msra.mxu0 %v2129_v44  ;;  %v1627_v44 = vld [vmem:[%s3362_s3 + $0x5a0] sm:$0xff]  ;;  %v2181_v50 = vpack.c.bf16 %v1610_v40, %v1609_v39  ;;  %v1606_v39 = vld [vmem:[%s3362_s3 + $0x4f8] sm:$0xff] }
 0x137   : > { %2132 = vmatprep.subr.bf16.mxu0 %v2131_v48  ;;  %v1579_v48 = vld [vmem:[%s3362_s3 + $0x420] sm:$0xff]  ;;  %v2183_v53 = vpack.c.bf16 %v1628_v45, %v1627_v44  ;;  %v2169_v44 = vpack.c.bf16 %v1588_v36, %v1587_v35  ;;  %v1637_v45 = vld [vmem:[%s3362_s3 + $0x5f0] sm:$0xff]  ;;  %v1694_v36 = vld [vmem:[%s3362_s3 + $0x7b8] sm:$0xff] }
 0x138   : > { %2102 = vmatpush3.bf16.msra.mxu1 %v2101_v51  ;;  %v1597_v51 = vld [vmem:[%s3362_s3 + $0x4b0] sm:$0xff]  ;;  %v2153_v57 = vpack.c.bf16 %v1580_v49, %v1579_v48 }
 0x139   : > { %2104 = vmatprep.subr.bf16.mxu1 %v2103_v55  ;;  %v1611_v55 = vld [vmem:[%s3362_s3 + $0x520] sm:$0xff]  ;;  %v2155_v61 = vpack.c.bf16 %v1598_v52, %v1597_v51  ;;  %v1589_v49 = vld [vmem:[%s3362_s3 + $0x470] sm:$0xff] }
 0x13a   : > { %2134 = vmatpush3.bf16.msra.mxu0 %v2133_v58  ;;  %v1629_v58 = vld [vmem:[%s3362_s3 + $0x5b0] sm:$0xff]  ;;  %v2185_v0 = vpack.c.bf16 %v1612_v56, %v1611_v55  ;;  %v1655_v52 = vld [vmem:[%s3362_s3 + $0x680] sm:$0xff] }
 0x13b   : > { %2136 = vmatprep.subr.bf16.mxu0 %v2135_v62  ;;  %v1581_v62 = vld [vmem:[%s3362_s3 + $0x430] sm:$0xff]  ;;  %v2187_v4 = vpack.c.bf16 %v1630_v60, %v1629_v58  ;;  %v1687_v60 = vld [vmem:[%s3362_s3 + $0x780] sm:$0xff] }
 0x13c   : > { %2106 = vmatpush3.bf16.msra.mxu1 %v2105_v2  ;;  %v1599_v2 = vld [vmem:[%s3362_s3 + $0x4c0] sm:$0xff]  ;;  %v2157_v7 = vpack.c.bf16 %v1582_v63, %v1581_v62  ;;  %v1621_v56 = vld [vmem:[%s3362_s3 + $0x570] sm:$0xff] }
 0x13d   : > { %2108 = vmatprep.subr.bf16.mxu1 %v2107_v5  ;;  %v1613_v5 = vld [vmem:[%s3362_s3 + $0x530] sm:$0xff]  ;;  %v2159_v10 = vpack.c.bf16 %v1600_v3, %v1599_v2  ;;  %v1639_v63 = vld [vmem:[%s3362_s3 + $0x600] sm:$0xff] }
 0x13e   : > { %2138 = vmatpush3.bf16.msra.mxu0 %v2137_v8  ;;  %v1631_v8 = vld [vmem:[%s3362_s3 + $0x5c0] sm:$0xff]  ;;  %v2189_v13 = vpack.c.bf16 %v1614_v6, %v1613_v5  ;;  %v1657_v3 = vld [vmem:[%s3362_s3 + $0x690] sm:$0xff] }
 0x13f   : > { %2140 = vmatprep.subr.bf16.mxu0 %v2139_v11  ;;  %v1583_v11 = vld [vmem:[%s3362_s3 + $0x440] sm:$0xff]  ;;  %v2191_v16 = vpack.c.bf16 %v1632_v9, %v1631_v8  ;;  %v1689_v9 = vld [vmem:[%s3362_s3 + $0x790] sm:$0xff] }
 0x140   : > { %2110 = vmatpush3.bf16.msra.mxu1 %v2109_v14  ;;  %v1601_v14 = vld [vmem:[%s3362_s3 + $0x4d0] sm:$0xff]  ;;  %v2161_v19 = vpack.c.bf16 %v1584_v12, %v1583_v11  ;;  %v1671_v6 = vld [vmem:[%s3362_s3 + $0x700] sm:$0xff]  ;;  %v944_v11 = vrot.slane %v2716_v42, 2 }
 0x141   : > { %2144 = vmatprep.subr.bf16.mxu1 %v2143_v17  ;;  %v1615_v17 = vld [vmem:[%s3362_s3 + $0x540] sm:$0xff]  ;;  %v2163_v22 = vpack.c.bf16 %v1602_v15, %v1601_v14  ;;  %v1642_v14 = vld [vmem:[%s3362_s3 + $0x618] sm:$0xff]  ;;  %v1159_v15 = vrot.slane %v2724_v46, 3  ;;  %v1693_v35 = vld [vmem:[%s3362_s3 + $0x7b0] sm:$0xff] }
 0x142   : > { %2142 = vmatpush3.bf16.msra.mxu0 %v2141_v20  ;;  %v1633_v20 = vld [vmem:[%s3362_s3 + $0x5d0] sm:$0xff]  ;;  %v2193_v25 = vpack.c.bf16 %v1616_v18, %v1615_v17  ;;  %v1659_v17 = vld [vmem:[%s3362_s3 + $0x6a0] sm:$0xff]  ;;  %v1660_v18 = vld [vmem:[%s3362_s3 + $0x6a8] sm:$0xff] }
 0x143   : > { %803 = vmatmul.mubr.f32.vlgmr.msra.gmra.mrb[2].mxu1 %v730_v29  ;;  %2176 = vmatprep.subr.bf16.mxu0 %v2175_v23  ;;  %v1585_v23 = vld [vmem:[%s3362_s3 + $0x450] sm:$0xff]  ;;  %v2195_v28 = vpack.c.bf16 %v1634_v21, %v1633_v20  ;;  %v1674_v46 = vld [vmem:[%s3362_s3 + $0x718] sm:$0xff] }
 0x144   : > { %2146 = vmatpush3.bf16.msra.mxu1 %v2145_v26  ;;  %1016 = vmatprep.mubr.f32.mxu1 %v945_v33  ;;  %v1603_v26 = vld [vmem:[%s3362_s3 + $0x4e0] sm:$0xff]  ;;  %v1617_v29 = vld [vmem:[%s3362_s3 + $0x550] sm:$0xff]  ;;  %v2165_v31 = vpack.c.bf16 %v1586_v24, %v1585_v23  ;;  %v1636_v33 = vld [vmem:[%s3362_s3 + $0x5e8] sm:$0xff] }
 0x145   : > { %873 = vmatmul.mubr.f32.vlgmr.msra.gmra.mrb[4].mxu0 %v732_v37  ;;  %2148 = vmatprep.subr.bf16.mxu1 %v2147_v30  ;;  %v1618_v30 = vld [vmem:[%s3362_s3 + $0x558] sm:$0xff]  ;;  %v2199_v40 = vpack.c.bf16 %v1636_v33, %v1635_v32  ;;  %v1673_v21 = vld [vmem:[%s3362_s3 + $0x710] sm:$0xff]  ;;  %v1691_v24 = vld [vmem:[%s3362_s3 + $0x7a0] sm:$0xff] }
 0x146   : > { %2178 = vmatpush3.bf16.msra.mxu0 %v2177_v34  ;;  %1086 = vmatprep.mubr.f32.mxu0 %v947_v41  ;;  %v2167_v34 = vpack.c.bf16 %v1604_v27, %v1603_v26  ;;  %v2197_v37 = vpack.c.bf16 %v1618_v30, %v1617_v29  ;;  %v1619_v41 = vld [vmem:[%s3362_s3 + $0x560] sm:$0xff]  ;;  %v2215_v26 = vpack.c.bf16 %v1660_v18, %v1659_v17  ;;  %v1661_v29 = vld [vmem:[%s3362_s3 + $0x6b0] sm:$0xff]  ;;  %v1662_v30 = vld [vmem:[%s3362_s3 + $0x6b8] sm:$0xff] }
 0x147   : > { %2180 = vmatprep.subr.bf16.mxu0 %v2179_v38  ;;  %v1605_v38 = vld [vmem:[%s3362_s3 + $0x4f0] sm:$0xff]  ;;  %v1643_v27 = vld [vmem:[%s3362_s3 + $0x620] sm:$0xff]  ;;  %v1676_v33 = vld [vmem:[%s3362_s3 + $0x728] sm:$0xff] }
 0x148   : > { %2150 = vmatpush3.bf16.msra.mxu1 %v2149_v43  ;;  %v1620_v43 = vld [vmem:[%s3362_s3 + $0x568] sm:$0xff]  ;;  %v2171_v48 = vpack.c.bf16 %v1606_v39, %v1605_v38  ;;  %v1675_v32 = vld [vmem:[%s3362_s3 + $0x720] sm:$0xff]  ;;  %v1645_v38 = vld [vmem:[%s3362_s3 + $0x630] sm:$0xff] }
 0x149   : > { %2152 = vmatprep.subr.bf16.mxu1 %v2151_v47  ;;  %v1638_v47 = vld [vmem:[%s3362_s3 + $0x5f8] sm:$0xff]  ;;  %v2201_v51 = vpack.c.bf16 %v1620_v43, %v1619_v41  ;;  %v1663_v41 = vld [vmem:[%s3362_s3 + $0x6c0] sm:$0xff]  ;;  %v1664_v43 = vld [vmem:[%s3362_s3 + $0x6c8] sm:$0xff] }
 0x14a   : > { %2182 = vmatpush3.bf16.msra.mxu0 %v2181_v50  ;;  %v1590_v50 = vld [vmem:[%s3362_s3 + $0x478] sm:$0xff]  ;;  %v2203_v55 = vpack.c.bf16 %v1638_v47, %v1637_v45  ;;  %v1677_v45 = vld [vmem:[%s3362_s3 + $0x730] sm:$0xff] }
 0x14b   : > { %2184 = vmatprep.subr.bf16.mxu0 %v2183_v53  ;;  %v1656_v53 = vld [vmem:[%s3362_s3 + $0x688] sm:$0xff]  ;;  %v2173_v58 = vpack.c.bf16 %v1590_v50, %v1589_v49  ;;  %v1646_v39 = vld [vmem:[%s3362_s3 + $0x638] sm:$0xff]  ;;  %v1695_v49 = vld [vmem:[%s3362_s3 + $0x7c0] sm:$0xff] }
 0x14c   : > { %2154 = vmatpush3.bf16.msra.mxu1 %v2153_v57  ;;  %v1622_v57 = vld [vmem:[%s3362_s3 + $0x578] sm:$0xff]  ;;  %v2207_v62 = vpack.c.bf16 %v1656_v53, %v1655_v52  ;;  %v1696_v50 = vld [vmem:[%s3362_s3 + $0x7c8] sm:$0xff]  ;;  %v1647_v52 = vld [vmem:[%s3362_s3 + $0x640] sm:$0xff] }
 0x14d   : > { %2156 = vmatprep.subr.bf16.mxu1 %v2155_v61  ;;  %v1688_v61 = vld [vmem:[%s3362_s3 + $0x788] sm:$0xff]  ;;  %v2205_v2 = vpack.c.bf16 %v1622_v57, %v1621_v56  ;;  %v1678_v47 = vld [vmem:[%s3362_s3 + $0x738] sm:$0xff]  ;;  %v1665_v56 = vld [vmem:[%s3362_s3 + $0x6d0] sm:$0xff] }
 0x14e   : > { %2186 = vmatpush3.bf16.msra.mxu0 %v2185_v0  ;;  %v1640_v0 = vld [vmem:[%s3362_s3 + $0x608] sm:$0xff]  ;;  %v2239_v5 = vpack.c.bf16 %v1688_v61, %v1687_v60  ;;  %v1666_v57 = vld [vmem:[%s3362_s3 + $0x6d8] sm:$0xff]  ;;  %v1679_v60 = vld [vmem:[%s3362_s3 + $0x740] sm:$0xff] }
 0x14f   : > { %2188 = vmatprep.subr.bf16.mxu0 %v2187_v4  ;;  %v1658_v4 = vld [vmem:[%s3362_s3 + $0x698] sm:$0xff]  ;;  %v2209_v8 = vpack.c.bf16 %v1640_v0, %v1639_v63  ;;  %v1648_v53 = vld [vmem:[%s3362_s3 + $0x648] sm:$0xff]  ;;  %v1697_v63 = vld [vmem:[%s3362_s3 + $0x7d0] sm:$0xff] }
 0x150   : > { %2158 = vmatpush3.bf16.msra.mxu1 %v2157_v7  ;;  %v1672_v7 = vld [vmem:[%s3362_s3 + $0x708] sm:$0xff]  ;;  %v2211_v12 = vpack.c.bf16 %v1658_v4, %v1657_v3  ;;  %v1698_v0 = vld [vmem:[%s3362_s3 + $0x7d8] sm:$0xff]  ;;  %v1649_v3 = vld [vmem:[%s3362_s3 + $0x650] sm:$0xff] }
 0x151   : > { %2160 = vmatprep.subr.bf16.mxu1 %v2159_v10  ;;  %v1690_v10 = vld [vmem:[%s3362_s3 + $0x798] sm:$0xff]  ;;  %v1680_v61 = vld [vmem:[%s3362_s3 + $0x748] sm:$0xff]  ;;  %v1669_v18 = vld [vmem:[%s3362_s3 + $0x6f0] sm:$0xff] }
 0x152   : > { %2190 = vmatpush3.bf16.msra.mxu0 %v2189_v13  ;;  %v1641_v13 = vld [vmem:[%s3362_s3 + $0x610] sm:$0xff]  ;;  %v2243_v20 = vpack.c.bf16 %v1690_v10, %v1689_v9  ;;  %v1650_v4 = vld [vmem:[%s3362_s3 + $0x658] sm:$0xff] }
 0x153   : > { %2192 = vmatprep.subr.bf16.mxu0 %v2191_v16  ;;  %v2241_v16 = vpack.c.bf16 %v1672_v7, %v1671_v6  ;;  %v2213_v23 = vpack.c.bf16 %v1642_v14, %v1641_v13  ;;  %v1667_v6 = vld [vmem:[%s3362_s3 + $0x6e0] sm:$0xff]  ;;  %v1668_v7 = vld [vmem:[%s3362_s3 + $0x6e8] sm:$0xff]  ;;  %v1681_v9 = vld [vmem:[%s3362_s3 + $0x750] sm:$0xff] }
 0x154   : > { %2162 = vmatpush3.bf16.msra.mxu1 %v2161_v19  ;;  %v946_v19 = vrot.slane %v2758_v59, 2  ;;  %v1682_v10 = vld [vmem:[%s3362_s3 + $0x758] sm:$0xff]  ;;  %v1700_v13 = vld [vmem:[%s3362_s3 + $0x7e8] sm:$0xff]  ;;  %v2231_v14 = vpack.c.bf16 %v1668_v7, %v1667_v6  ;;  %v1324_v7 = vld [vmem:[%s3364_s5] sm:$0xff] }
 0x155   : > { %2164 = vmatprep.subr.bf16.mxu1 %v2163_v22  ;;  %v1161_v22 = vrot.slane %v2746_v54, 3  ;;  %v1644_v54 = vld [vmem:[%s3362_s3 + $0x628] sm:$0xff]  ;;  %v2261_v17 = vpack.c.bf16 %v1682_v10, %v1681_v9 }
 0x156   : > { %2194 = vmatpush3.bf16.msra.mxu0 %v2193_v25  ;;  %v1692_v25 = vld [vmem:[%s3362_s3 + $0x7a8] sm:$0xff] }
 0x157   : > { %2196 = vmatprep.subr.bf16.mxu0 %v2195_v28  ;;  %v2245_v28 = vpack.c.bf16 %v1674_v46, %v1673_v21  ;;  %v1683_v21 = vld [vmem:[%s3362_s3 + $0x760] sm:$0xff]  ;;  %v1684_v46 = vld [vmem:[%s3362_s3 + $0x768] sm:$0xff] }
 0x158   : > { %2166 = vmatpush3.bf16.msra.mxu1 %v2165_v31  ;;  %v2247_v31 = vpack.c.bf16 %v1692_v25, %v1691_v24  ;;  %v1702_v24 = vld [vmem:[%s3362_s3 + $0x7f8] sm:$0xff] }
 0x159   : > { %2168 = vmatprep.subr.bf16.mxu1 %v2167_v34  ;;  %v2217_v34 = vpack.c.bf16 %v1644_v54, %v1643_v27  ;;  %v1654_v27 = vld [vmem:[%s3362_s3 + $0x678] sm:$0xff]  ;;  %v2265_v54 = vpack.c.bf16 %v1684_v46, %v1683_v21 }
 0x15a   : > { %2198 = vmatpush3.bf16.msra.mxu0 %v2197_v37  ;;  %v2219_v37 = vpack.c.bf16 %v1662_v30, %v1661_v29  ;;  %v1685_v29 = vld [vmem:[%s3362_s3 + $0x770] sm:$0xff]  ;;  %v1686_v30 = vld [vmem:[%s3362_s3 + $0x778] sm:$0xff] }
 0x15b   : > { %2200 = vmatprep.subr.bf16.mxu0 %v2199_v40  ;;  %v2249_v40 = vpack.c.bf16 %v1676_v33, %v1675_v32  ;;  %v2269_v32 = vpack.c.bf16 %v1686_v30, %v1685_v29  ;;  %v1158_v33 = vrot.slane %v2716_v42, 3  ;;  %v457_v42 = vld [vmem:[%s3363_s4] sm:$0x1] }
 0x15c   : > { %2170 = vmatpush3.bf16.msra.mxu1 %v2169_v44  ;;  %v2251_v44 = vpack.c.bf16 %v1694_v36, %v1693_v35 }
 0x15d   : > { %2172 = vmatprep.subr.bf16.mxu1 %v2171_v48  ;;  %v2221_v48 = vpack.c.bf16 %v1646_v39, %v1645_v38 }
 0x15e   : > { %2202 = vmatpush3.bf16.msra.mxu0 %v2201_v51  ;;  %v2223_v51 = vpack.c.bf16 %v1664_v43, %v1663_v41 }
 0x15f   : > { %2204 = vmatprep.subr.bf16.mxu0 %v2203_v55  ;;  %v2253_v55 = vpack.c.bf16 %v1678_v47, %v1677_v45 }
 0x160   : > { %2174 = vmatpush3.bf16.msra.mxu1 %v2173_v58  ;;  %v2255_v58 = vpack.c.bf16 %v1696_v50, %v1695_v49 }
 0x161   : > { %2208 = vmatprep.subr.bf16.mxu1 %v2207_v62  ;;  %v2225_v62 = vpack.c.bf16 %v1648_v53, %v1647_v52 }
 0x162   : > { %2206 = vmatpush3.bf16.msra.mxu0 %v2205_v2  ;;  %v2227_v2 = vpack.c.bf16 %v1666_v57, %v1665_v56 }
 0x163   : > { %1017 = vmatmul.mubr.f32.vlgmr.msra.gmra.mrb[4].mxu1 %v944_v11  ;;  %2240 = vmatprep.subr.bf16.mxu0 %v2239_v5  ;;  %v2257_v5 = vpack.c.bf16 %v1680_v61, %v1679_v60  ;;  %v2229_v11 = vpack.c.bf16 %v1650_v4, %v1649_v3 }
 0x164   : > { %2210 = vmatpush3.bf16.msra.mxu1 %v2209_v8  ;;  %1230 = vmatprep.mubr.f32.mxu1 %v1159_v15  ;;  %v2259_v8 = vpack.c.bf16 %v1698_v0, %v1697_v63  ;;  %v1651_v15 = vld [vmem:[%s3362_s3 + $0x660] sm:$0xff] }
 0x165   : > { %1087 = vmatmul.mubr.f32.vlgmr.msra.gmra.mrb[6].mxu0 %v946_v19  ;;  %2212 = vmatprep.subr.bf16.mxu1 %v2211_v12  ;;  %v1699_v12 = vld [vmem:[%s3362_s3 + $0x7e0] sm:$0xff]  ;;  %v1670_v19 = vld [vmem:[%s3362_s3 + $0x6f8] sm:$0xff] }
 0x166   : > { %2242 = vmatpush3.bf16.msra.mxu0 %v2241_v16  ;;  %1300 = vmatprep.mubr.f32.mxu0 %v1161_v22  ;;  %v1652_v16 = vld [vmem:[%s3362_s3 + $0x668] sm:$0xff]  ;;  %v2235_v25 = vpack.c.bf16 %v1670_v19, %v1669_v18 }
 0x167   : > { %2244 = vmatprep.subr.bf16.mxu0 %v2243_v20  ;;  %v2263_v20 = vpack.c.bf16 %v1700_v13, %v1699_v12  ;;  %v2233_v22 = vpack.c.bf16 %v1652_v16, %v1651_v15 }
 0x168   : > { %2214 = vmatpush3.bf16.msra.mxu1 %v2213_v23  ;;  %v1701_v23 = vld [vmem:[%s3362_s3 + $0x7f0] sm:$0xff] }
 0x169   : > { %2216 = vmatprep.subr.bf16.mxu1 %v2215_v26  ;;  %v1653_v26 = vld [vmem:[%s3362_s3 + $0x670] sm:$0xff] }
 0x16a   : > { %2246 = vmatpush3.bf16.msra.mxu0 %v2245_v28  ;;  %v2267_v28 = vpack.c.bf16 %v1702_v24, %v1701_v23 }
 0x16b   : > { %2248 = vmatprep.subr.bf16.mxu0 %v2247_v31  ;;  %v2237_v31 = vpack.c.bf16 %v1654_v27, %v1653_v26 }
 0x16c   : > { %2218 = vmatpush3.bf16.msra.mxu1 %v2217_v34  ;;  %v1160_v34 = vrot.slane %v2758_v59, 3 }
 0x16d   : > { %2220 = vmatprep.subr.bf16.mxu1 %v2219_v37 }
 0x16e   : > { %2250 = vmatpush3.bf16.msra.mxu0 %v2249_v40 }
 0x16f   : > { %2252 = vmatprep.subr.bf16.mxu0 %v2251_v44 }
 0x170   : > { %2222 = vmatpush3.bf16.msra.mxu1 %v2221_v48 }
 0x171   : > { %2224 = vmatprep.subr.bf16.mxu1 %v2223_v51 }
 0x172   : > { %2254 = vmatpush3.bf16.msra.mxu0 %v2253_v55 }
 0x173   : > { %2256 = vmatprep.subr.bf16.mxu0 %v2255_v58 }
 0x174   : > { %2226 = vmatpush3.bf16.msra.mxu1 %v2225_v62 }
 0x175   : > { %2228 = vmatprep.subr.bf16.mxu1 %v2227_v2 }
 0x176   : > { %2258 = vmatpush3.bf16.msra.mxu0 %v2257_v5 }
 0x177   : > { %2260 = vmatprep.subr.bf16.mxu0 %v2259_v8 }
 0x178   : > { %2230 = vmatpush3.bf16.msra.mxu1 %v2229_v11 }
 0x179   : > { %2232 = vmatprep.subr.bf16.mxu1 %v2231_v14 }
 0x17a   : > { %2262 = vmatpush3.bf16.msra.mxu0 %v2261_v17 }
 0x17b   : > { %2264 = vmatprep.subr.bf16.mxu0 %v2263_v20 }
 0x17c   : > { %2234 = vmatpush3.bf16.msra.mxu1 %v2233_v22 }
 0x17d   : > { %2236 = vmatprep.subr.bf16.mxu1 %v2235_v25 }
 0x17e   : > { %2266 = vmatpush3.bf16.msra.mxu0 %v2265_v54 }
 0x17f   : > { %2268 = vmatprep.subr.bf16.mxu0 %v2267_v28 }
 0x180   : > { %2238 = vmatpush3.bf16.msra.mxu1 %v2237_v31 }
 0x181   : > { %1990 = vmatprep.subr.mxu1 %v2386_v1 }
 0x182   : > { %2270 = vmatpush3.bf16.msra.mxu0 %v2269_v32 }
 0x183   : > { %1231 = vmatmul.mubr.f32.vlgmr.msra.gmra.mrb[6].mxu1 %v1158_v33 }
 0x184   : > { %1991 = vmatpush3.msra.mxu1 %v1324_v7  ;;  %1992 = vmatprep.mubr.msk.f32.mxu1 %vm2389_vm3, %v2386_v1  ;;  %v1325_v1 = vld [vmem:[%s3365_s6] sm:$0x1] }
 0x185   : > { %1301 = vmatmul.mubr.f32.vlgmr.msra.gmra.mrb[8].mxu0 %v1160_v34 }
 0x1f6   : > { %v1740_v35 = vpop.f32.mrb[0].mxu1 }
 0x1f7   : > { %v1741_v36 = vpop.f32.mrb[1].mxu1 }
 0x1f8   : > { %v1742_v37 = vadd.f32 %v1741_v36, %v1740_v35  ;;  %v1775_v38 = vpop.f32.mrb[2].mxu0 }
 0x1f9   : > { %v1776_v39 = vpop.f32.mrb[3].mxu0 }
 0x1fa   : > { %v1777_v40 = vadd.f32 %v1776_v39, %v1775_v38 }
 0x1fc   : > { %v659_v41 = vadd.f32 %v1777_v40, %v1742_v37 }
 0x1fe   : > { %v662_v50 = vadd.f32 %v659_v41, %v457_v42 }
 0x216   : > { %v1810_v43 = vpop.f32.mrb[2].mxu1 }
 0x217   : > { %v1811_v44 = vpop.f32.mrb[3].mxu1 }
 0x218   : > { %v1812_v45 = vadd.f32 %v1811_v44, %v1810_v43  ;;  %v1845_v47 = vpop.f32.mrb[4].mxu0 }
 0x219   : > { %v1846_v48 = vpop.f32.mrb[5].mxu0 }
 0x21a   : > { %v1847_v49 = vadd.f32 %v1846_v48, %v1845_v47 }
 0x21c   : > { %v875_v59 = vadd.f32 %v1847_v49, %v1812_v45 }
 0x21e   : > { %v878_v51 = vadd.f32 %v875_v59, %v662_v50 }
 0x236   : > { %v1880_v52 = vpop.f32.mrb[4].mxu1 }
 0x237   : > { %v1881_v53 = vpop.f32.mrb[5].mxu1 }
 0x238   : > { %v1882_v55 = vadd.f32 %v1881_v53, %v1880_v52  ;;  %v1915_v56 = vpop.f32.mrb[6].mxu0 }
 0x239   : > { %v1916_v57 = vpop.f32.mrb[7].mxu0 }
 0x23a   : > { %v1917_v58 = vadd.f32 %v1916_v57, %v1915_v56 }
 0x23c   : > { %v1089_v60 = vadd.f32 %v1917_v58, %v1882_v55 }
 0x23e   : > { %v1092_v61 = vadd.f32 %v1089_v60, %v878_v51 }
 0x256   : > { %v1950_v62 = vpop.f32.mrb[6].mxu1 }
 0x257   : > { %v1951_v63 = vpop.f32.mrb[7].mxu1 }
 0x258   : > { %v1952_v0 = vadd.f32 %v1951_v63, %v1950_v62  ;;  %v1985_v2 = vpop.f32.mrb[8].mxu0 }
 0x259   : > { %v1986_v3 = vpop.f32.mrb[9].mxu0 }
 0x25a   : > { %v1987_v4 = vadd.f32 %v1986_v3, %v1985_v2 }
 0x25c   : > { %v1303_v5 = vadd.f32 %v1987_v4, %v1952_v0 }
 0x25e   : > { %v1306_v6 = vadd.f32 %v1303_v5, %v1092_v61 }
 0x260   : > { %1308 = vrot.lane.b32.xlu0 %v1306_v6, %s2388_s23  ;;  %s2322_s23 = scalar_lea.vmem %s3319_s25, 16 }
 0x261   : > { %p2323_p11 = scmp.ne.s32.totalorder %s3319_s25, %s2322_s23  ;;  %p2330_p1 = scmp.lt.s32.totalorder %s2328_s10, %s2322_s23 }
 0x263   : > { %p2324_p12 = pnand %p2323_p11, %p2474_p5  ;;  %p2331_p2 = por %p2330_p1, %p2329_p0 }
 0x265   : > { %p2325_p13 = pneg %p2324_p12 }
 0x267   : > { %p2332_p3 = pnand %p2331_p2, %p2325_p13 }
 0x2d2   : > { %v1309_v8 = vpop.permute.xlu0 %1308 }
 0x2d3   : > { %v1311_v9 = vmax.f32 %v1306_v6, %v1309_v8 }
 0x2d5   : > { %v1312_v10 = vmax.f32 %v1311_v9, 0.0 }
 0x2d7   : > { %v1313_v11 = vmul.f32 0.001, %v1312_v10 }
 0x2d9   : > { %v1314_v12 = vadd.f32 1.0, %v1313_v11  ;;  %v1317_v13 = vmul.f32 -0.5, %v1313_v11  ;;  %v1320_v15 = vand.u32 2147483647, %v1313_v11 }
 0x2db   : > { %2320 = vlog2.f32 %v1314_v12  ;;  %v1318_v14 = vadd.f32 1.0, %v1317_v13  ;;  %vm1321_vm4 = vcmp.lt.f32.partialorder %v1320_v15, 0.0004427343 }
 0x2dd   : > { %v1319_v18 = vmul.f32 %v1318_v14, %v1313_v11 }
 0x2e5   : > { %v2321_v16 = vpop.eup %2320 }
 0x2e6   : > { %v1316_v17 = vmul.f32 0.6931472, %v2321_v16 }
 0x2e8   : > { %v1322_v19 = vsel %vm1321_vm4, %v1319_v18, %v1316_v17 }
 0x2e9   : > { %v1323_v20 = vmul.f32 1000.0, %v1322_v19 }
 0x2eb   : > { %1993 = vmatmul.mubr.msk.f32.vlgmr.msra.gmra.mrb[8].mxu1 %vm1326_vm5, %v1323_v20 }
 0x3be   : > { %v1396_v21 = vpop.f32.mrb[8].mxu1 }
 0x3bf   : > { %v1397_v46 = vadd.f32 %v1396_v21, %v1325_v1  ;;  %v1994_v22 = vpop.f32.mrb[9].mxu1 }
 0x3c1   : > { %1401 = vst.msk [vmem:[%s305_s17] sm:$0x1] %vm1400_vm6, %v1397_v46 }
 0x3c2   : > { %2335 = shalt.err (!%p2332_p3)
}
 0x3c3   : > { %s2336_s12 = scalar_lea.hbm %s3317_s20, 16  ;;  %s2340_s24 = scalar_lea.hbm %s3367_s8, 32 }
 0x3c4   : > { %p2337_p4 = scmp.ne.s32.totalorder %s3317_s20, %s2336_s12  ;;  %p2341_p9 = scmp.lt.u32.totalorder %s3317_s20, %s3367_s8 }
 0x3c5   : > { %p2342_p10 = scmp.lt.u32.totalorder %s2340_s24, %s2336_s12  ;;  %p2344_p12 = scmp.lt.u32.totalorder %s2336_s12, %s3317_s20 }
 0x3c6   : > { %p2338_p7 = pnand %p2337_p4, %p2474_p5 }
 0x3c7   : > { %p2343_p11 = por %p2342_p10, %p2341_p9 }
 0x3c8   : > { %p2339_p8 = pneg %p2338_p7 }
 0x3c9   : > { %p2345_p13 = por %p2344_p12, %p2343_p11 }
 0x3cb   : > { %p2346_p0 = pnand %p2345_p13, %p2339_p8 }
 0x3cd   : > { %2349 = shalt.err (!%p2346_p0)
}
 0x3ce   : > { %2272 = dma.vmem_to_hbm [thread:$0]  (%p2474_p5), %s3319_s25, 16, %s3317_s20, %s1408_s22  }
 0x3cf PF: > { %p2278_p1 = scmp.ge.s32.totalorder %s2384_s30, 2  ;;  %s1443_s19 = sand.u32 1, %s2372_s27  }
 0x3d0   : > { %s1444_s23 = scalar_lea.sflag [#allocation3], %s1443_s19 }
 0x3d1   : > { %p2275_p2 = pnand %p2278_p1, %p2478_p6 }
 0x3d3   : > { %2367 = dma.done.wait (!%p2275_p2), %s1444_s23, 16  }
 0x3d4   : > { %2369 = vsyncadd (!%p2275_p2), %s1444_s23, 4294967280  ;;  %p19_p3 = scmp.ge.s32.totalorder %s2461_s11, 4   ;;  %s3370_s27 = smov %s2376_s28 }
 0x3d5   : > { %s3371_s28 = smov %s2380_s29  ;;  %s3372_s29 = smov %s2472_s14 }
 0x3d6   : > { %s3373_s30 = smov %s2461_s11  ;;  %21 = sbr.rel (!%p19_p3) target bundleno = 3 (0x3), region = 98 }
 0x3dd   :  { %1448 = vsyncpa [#allocation3], 1 }
 0x3de   :  { %1450 = vsyncpa [#allocation3 + $0x1], 1 }

</bundles_post_ra>
